<compile_context>
chip_gen: v5e
topology: v5e:2x2
jax: 0.10.0
libtpu: 0.0.40
codegen_flags: <defaults>
</compile_context>

<pallas_src>
import functools
import math

import jax
import jax.numpy as jnp
from jax.experimental import pallas as pl
from jax.experimental.pallas import tpu as pltpu

VMEM_SPEC = pl.BlockSpec(memory_space=pltpu.MemorySpace.VMEM)


def _derive_vmem_limit():
    """Generation-aware scoped-VMEM cap: ~75% of physical, never above 100 MiB."""
    cap = 64 * 1024 * 1024  # conservative fallback (v7x physical per-TC VMEM)
    try:
        info = pltpu.get_tpu_info()
        cap = int(getattr(info, "vmem_capacity_bytes", cap))
    except Exception:  # pragma: no cover - e.g. interpret mode / old jax
        pass
    return int(min(cap * 0.75, 100 * 1024 * 1024))


_VMEM_LIMIT = _derive_vmem_limit()
_TILE_BUDGET = int(_VMEM_LIMIT * 0.8)          # leave room for compiler scratch
_TM_CANDIDATES = (1024, 512, 256, 128, 64, 32, 16, 8)
_TN_CANDIDATES = (8192, 4096, 3072, 2048, 1024, 768, 512, 384, 256, 128)


def _choose_tiles(M, K, N, in_bytes, out_bytes, budget=_TILE_BUDGET):
    """Pick (tm, tn): prefer tn == N (weights resident, streamed once), big tm."""

    def footprint(tm, tn):
        # double-buffered x block + weight block + output block + bias row
        return 2 * (tm * K * in_bytes + K * tn * in_bytes
                    + tm * tn * out_bytes + tn * 4)

    def pick_tm(tn):
        for tm in _TM_CANDIDATES:
            if tm <= M and M % tm == 0 and footprint(tm, tn) <= budget:
                return tm
        if footprint(M, tn) <= budget:   # tiny / non-8-divisible M
            return M
        return None

    for tn in (N,) + tuple(t for t in _TN_CANDIDATES if t < N and N % t == 0):
        tm = pick_tm(tn)
        if tm is not None:
            return tm, tn
    return M, N  # last resort (tiny shapes)


# ----------------------------- Pallas kernels ------------------------------

def _linear_kernel(x_ref, w_ref, b_ref, o_ref, *, activation):
    """Single-shot matmul (K unsplit): bf16 operands, f32 math, fused epilogue."""
    y = jnp.dot(x_ref[...], w_ref[...], preferred_element_type=jnp.float32)
    y = y + b_ref[...]
    if activation == "gelu":
        # tanh-approx GELU in f32 (BERT uses erf-GELU; <1e-3 drift, synthetic weights).
        c = jnp.float32(0.7978845608028654)  # sqrt(2/pi)
        y = 0.5 * y * (1.0 + jnp.tanh(c * (y + 0.044715 * y * y * y)))
    o_ref[...] = y.astype(o_ref.dtype)


def linear(x, w, b, activation="none", out_dtype=jnp.bfloat16):
    """x: (M, K) bf16, w: (K, N) bf16, b: (N,) f32 -> (M, N) out_dtype."""
    M, K = x.shape
    N = w.shape[1]
    tm, tn = _choose_tiles(M, K, N, x.dtype.itemsize, jnp.dtype(out_dtype).itemsize)
    grid = (M // tm, N // tn)
    flops = 2 * M * N * K
    trans = M * N if activation == "gelu" else 0
    bytes_acc = (M * K + K * N) * x.dtype.itemsize + M * N * jnp.dtype(out_dtype).itemsize
    return pl.pallas_call(
        functools.partial(_linear_kernel, activation=activation),
        out_shape=jax.ShapeDtypeStruct((M, N), out_dtype),
        grid=grid,
        in_specs=[
            pl.BlockSpec((tm, K), lambda i, j: (i, 0)),   # x row panel (K unsplit)
            pl.BlockSpec((K, tn), lambda i, j: (0, j)),   # resident weight panel
            pl.BlockSpec((1, tn), lambda i, j: (0, j)),   # bias
        ],
        out_specs=pl.BlockSpec((tm, tn), lambda i, j: (i, j)),
        compiler_params=pltpu.CompilerParams(
            dimension_semantics=("parallel", "parallel"),
            vmem_limit_bytes=_VMEM_LIMIT),
        cost_estimate=pl.CostEstimate(
            flops=flops, transcendentals=trans, bytes_accessed=bytes_acc),
    )(x, w, b.reshape(1, N))


def _matmul_add_ln_kernel(x_ref, w_ref, b_ref, r_ref, g_ref, be_ref, o_ref, *, eps):
    """Fused: (x @ w + b) + residual -> LayerNorm over the full H (lane) axis."""
    y = jnp.dot(x_ref[...], w_ref[...], preferred_element_type=jnp.float32)
    y = y + b_ref[...] + r_ref[...].astype(jnp.float32)
    mean = jnp.mean(y, axis=-1, keepdims=True)
    var = jnp.mean((y - mean) ** 2, axis=-1, keepdims=True)
    y = (y - mean) * jax.lax.rsqrt(var + eps)
    o_ref[...] = (y * g_ref[...] + be_ref[...]).astype(o_ref.dtype)


def linear_add_layernorm(x, w, b, residual, gamma, beta,
                         eps=1e-12, out_dtype=jnp.bfloat16):
    """LayerNorm((x @ w + b) + residual). x: (M, K), w: (K, H), residual: (M, H)."""
    M, K = x.shape
    H = w.shape[1]
    in_b = x.dtype.itemsize
    out_b = jnp.dtype(out_dtype).itemsize

    def footprint(tm):
        return 2 * (tm * K * in_b + K * H * in_b + tm * H * in_b
                    + tm * H * out_b + 3 * H * 4)

    tm = M
    for cand in _TM_CANDIDATES:
        if cand <= M and M % cand == 0 and footprint(cand) <= _TILE_BUDGET:
            tm = cand
            break
    grid = (M // tm,)
    flops = 2 * M * H * K
    bytes_acc = ((M * K + K * H + M * H) * in_b + M * H * out_b)
    return pl.pallas_call(
        functools.partial(_matmul_add_ln_kernel, eps=eps),
        out_shape=jax.ShapeDtypeStruct((M, H), out_dtype),
        grid=grid,
        in_specs=[
            pl.BlockSpec((tm, K), lambda i: (i, 0)),   # x (K unsplit)
            pl.BlockSpec((K, H), lambda i: (0, 0)),    # resident weight
            pl.BlockSpec((1, H), lambda i: (0, 0)),    # bias
            pl.BlockSpec((tm, H), lambda i: (i, 0)),   # residual
            pl.BlockSpec((1, H), lambda i: (0, 0)),    # gamma
            pl.BlockSpec((1, H), lambda i: (0, 0)),    # beta
        ],
        out_specs=pl.BlockSpec((tm, H), lambda i: (i, 0)),
        compiler_params=pltpu.CompilerParams(
            dimension_semantics=("parallel",),
            vmem_limit_bytes=_VMEM_LIMIT),
        cost_estimate=pl.CostEstimate(
            flops=flops, transcendentals=M, bytes_accessed=bytes_acc),
    )(x, w, b.reshape(1, H), residual, gamma.reshape(1, H), beta.reshape(1, H))


def _embed_ln_kernel(w_ref, p_ref, t_ref, g_ref, b_ref, o_ref, *, eps):
    """Fused word+pos+type embedding sum -> LayerNorm (per batch block)."""
    x = (w_ref[...].astype(jnp.float32) + p_ref[...].astype(jnp.float32)
         + t_ref[...].astype(jnp.float32))
    mean = jnp.mean(x, axis=-1, keepdims=True)
    var = jnp.mean((x - mean) ** 2, axis=-1, keepdims=True)
    y = (x - mean) * jax.lax.rsqrt(var + eps)
    o_ref[...] = (y * g_ref[...] + b_ref[...]).astype(o_ref.dtype)


def embed_layernorm(word, pos, tok, gamma, beta, B, S,
                    eps=1e-12, out_dtype=jnp.bfloat16):
    """word: (B*S, H) bf16 (gather result), pos: (S, H), tok: (1, H)."""
    M, H = word.shape
    return pl.pallas_call(
        functools.partial(_embed_ln_kernel, eps=eps),
        out_shape=jax.ShapeDtypeStruct((M, H), out_dtype),
        grid=(B,),
        in_specs=[
            pl.BlockSpec((S, H), lambda b: (b, 0)),   # word rows of batch b
            pl.BlockSpec((S, H), lambda b: (0, 0)),   # positional embeddings
            pl.BlockSpec((1, H), lambda b: (0, 0)),   # token-type-0 embedding
            pl.BlockSpec((1, H), lambda b: (0, 0)),
            pl.BlockSpec((1, H), lambda b: (0, 0)),
        ],
        out_specs=pl.BlockSpec((S, H), lambda b: (b, 0)),
        compiler_params=pltpu.CompilerParams(
            dimension_semantics=("parallel",),
            vmem_limit_bytes=_VMEM_LIMIT),
    )(word, pos, tok, gamma.reshape(1, H), beta.reshape(1, H))


def _attention_kernel(qkv_ref, m_ref, o_ref, *, nh, dh):
    """One batch: all heads of softmax(q k^T + mask) v, read straight from the
    fused (S, 3H) qkv block, written as one lane-dense (S, H) slab."""
    H = nh * dh
    mask = m_ref[0]                                    # (1, S) additive mask
    ctxs = []
    for h in range(nh):                                # static unroll over heads
        q = qkv_ref[:, h * dh:(h + 1) * dh]            # (S, dh) bf16, scale pre-folded
        k = qkv_ref[:, H + h * dh:H + (h + 1) * dh]
        v = qkv_ref[:, 2 * H + h * dh:2 * H + (h + 1) * dh]
        s = jax.lax.dot_general(q, k, (((1,), (1,)), ((), ())),
                                preferred_element_type=jnp.float32)   # (S, S)
        s = s + mask                                   # broadcast over query rows
        s = s - jnp.max(s, axis=-1, keepdims=True)
        p = jnp.exp(s)
        p = p * pl.reciprocal(jnp.sum(p, axis=-1, keepdims=True), approx=True)
        ctxs.append(jnp.dot(p.astype(v.dtype), v, preferred_element_type=jnp.float32))
    o_ref[...] = jnp.concatenate(ctxs, axis=-1).astype(o_ref.dtype)


def attention(qkv, mask_add, *, B, S, nh, dh):
    """qkv: (B*S, 3H) bf16 fused projection; mask_add: (B, 1, S) f32 additive mask.
    Returns (B*S, H) context with heads packed (no XLA transposes)."""
    H = nh * dh
    M = B * S
    # TODO(synk): flash-style online-softmax tiling over S for long sequences.
    return pl.pallas_call(
        functools.partial(_attention_kernel, nh=nh, dh=dh),
        out_shape=jax.ShapeDtypeStruct((M, H), qkv.dtype),
        grid=(B,),
        in_specs=[
            pl.BlockSpec((S, 3 * H), lambda b: (b, 0)),   # qkv rows of batch b
            pl.BlockSpec((1, 1, S), lambda b: (b, 0, 0)),
        ],
        out_specs=pl.BlockSpec((S, H), lambda b: (b, 0)),
        compiler_params=pltpu.CompilerParams(
            dimension_semantics=("parallel",),
            vmem_limit_bytes=_VMEM_LIMIT),
        cost_estimate=pl.CostEstimate(
            flops=4 * B * nh * S * S * dh,
            transcendentals=B * nh * S * S,
            bytes_accessed=(M * 3 * H + M * H) * qkv.dtype.itemsize + B * S * 4),
    )(qkv, mask_add)


def _head_kernel(x_ref, pw_ref, pb_ref, cw_ref, cb_ref, o_ref):
    """BERT pooler (tanh) + dropout(identity at inference) + classifier."""
    pooled = jnp.dot(x_ref[...], pw_ref[...],
                     preferred_element_type=jnp.float32) + pb_ref[...]
    pooled = jnp.tanh(pooled)
    logits = jnp.dot(pooled.astype(cw_ref.dtype), cw_ref[...],
                     preferred_element_type=jnp.float32) + cb_ref[...]
    o_ref[...] = logits


def classifier_head(cls_tok, pool_w, pool_b, cls_w, cls_b):
    """cls_tok: (B, H) bf16 -> logits (B, n_classes) f32. Tiny, gridless."""
    B, H = cls_tok.shape
    n_classes = cls_w.shape[1]
    return pl.pallas_call(
        _head_kernel,
        out_shape=jax.ShapeDtypeStruct((B, n_classes), jnp.float32),
        in_specs=[VMEM_SPEC] * 5,
        out_specs=VMEM_SPEC,
        compiler_params=pltpu.CompilerParams(vmem_limit_bytes=_VMEM_LIMIT),
    )(cls_tok, pool_w, pool_b.reshape(1, H), cls_w, cls_b.reshape(1, n_classes))


# ----------------------------- parameter init ------------------------------

def init_params(key, cfg):
    keys = iter(jax.random.split(key, 64))
    H, I, nh = cfg["hidden"], cfg["intermediate"], cfg["heads"]
    dh = H // nh
    wdt = jnp.bfloat16

    def dense(kin, kout):
        w = (jax.random.normal(next(keys), (kin, kout), jnp.float32) * 0.02).astype(wdt)
        return w, jnp.zeros((kout,), jnp.float32)

    params = {
        "word_emb": (jax.random.normal(next(keys), (cfg["vocab"], H), jnp.float32) * 0.02).astype(wdt),
        "pos_emb": (jax.random.normal(next(keys), (cfg["max_pos"], H), jnp.float32) * 0.02).astype(wdt),
        "type_emb": (jax.random.normal(next(keys), (2, H), jnp.float32) * 0.02).astype(wdt),
        "emb_ln_g": jnp.ones((H,), jnp.float32),
        "emb_ln_b": jnp.zeros((H,), jnp.float32),
        "layers": [],
    }
    scale = 1.0 / math.sqrt(dh)
    for _ in range(cfg["layers"]):
        lp = {}
        q_w, q_b = dense(H, H)
        k_w, k_b = dense(H, H)
        v_w, v_b = dense(H, H)
        # Fused QKV projection; 1/sqrt(dh) attention scale folded into the Q slice.
        lp["qkv_w"] = jnp.concatenate(
            [(q_w.astype(jnp.float32) * scale).astype(wdt), k_w, v_w], axis=1)
        lp["qkv_b"] = jnp.concatenate([q_b * scale, k_b, v_b])
        lp["ao_w"], lp["ao_b"] = dense(H, H)
        lp["ln1_g"], lp["ln1_b"] = jnp.ones((H,), jnp.float32), jnp.zeros((H,), jnp.float32)
        lp["fi_w"], lp["fi_b"] = dense(H, I)
        lp["fo_w"], lp["fo_b"] = dense(I, H)
        lp["ln2_g"], lp["ln2_b"] = jnp.ones((H,), jnp.float32), jnp.zeros((H,), jnp.float32)
        params["layers"].append(lp)
    params["pool_w"], params["pool_b"] = dense(H, H)               # BERT pooler
    params["cls_w"], params["cls_b"] = dense(H, cfg["n_classes"])  # self.out
    return params


# ------------------------------ forward pass -------------------------------

def sentiment_classifier_forward(params, input_ids, attention_mask, cfg):
    B, S = input_ids.shape
    H, nh = cfg["hidden"], cfg["heads"]
    dh = H // nh
    M = B * S

    # Embedding gather stays XLA glue; sum + LayerNorm is fused in one kernel
    # (no (M, H) f32 intermediate ever touches HBM).
    word = jnp.take(params["word_emb"], input_ids.reshape(-1), axis=0)    # (M, H) bf16
    pos = params["pos_emb"][:S]                                           # (S, H) bf16
    tok = params["type_emb"][0:1]                                         # (1, H), type ids = 0
    x = embed_layernorm(word, pos, tok, params["emb_ln_g"], params["emb_ln_b"],
                        B, S)                                             # (M, H) bf16

    # Additive mask kept at (B, 1, S); broadcast happens inside the attention kernel.
    mask_add = ((1.0 - attention_mask.astype(jnp.float32))
                * jnp.float32(-10000.0)).reshape(B, 1, S)

    for lp in params["layers"]:
        qkv = linear(x, lp["qkv_w"], lp["qkv_b"])                   # (M, 3H) fused QKV
        # Attention reads Q/K/V straight out of qkv and writes a packed (M, H)
        # context buffer — no head split/merge transposes in XLA.
        ctx = attention(qkv, mask_add, B=B, S=S, nh=nh, dh=dh)      # (M, H)

        # attention output projection + residual + LayerNorm, fused
        x = linear_add_layernorm(ctx, lp["ao_w"], lp["ao_b"], x,
                                 lp["ln1_g"], lp["ln1_b"])
        # FFN: intermediate GELU matmul, then output matmul + residual + LN, fused
        inter = linear(x, lp["fi_w"], lp["fi_b"], activation="gelu")
        x = linear_add_layernorm(inter, lp["fo_w"], lp["fo_b"], x,
                                 lp["ln2_g"], lp["ln2_b"])

    hidden = x.reshape(B, S, H)
    cls_tok = hidden[:, 0, :]                                       # (B, H)
    # nn.Dropout(p=0.3) is identity at inference time.
    # TODO(synk): training-mode stochastic dropout (pltpu.prng_*) not implemented.
    logits = classifier_head(cls_tok, params["pool_w"], params["pool_b"],
                             params["cls_w"], params["cls_b"])      # (B, n_classes)
    return logits


# ---------------------------------- main ------------------------------------

if __name__ == "__main__":
    cfg = dict(vocab=100, hidden=32, heads=2, layers=2, intermediate=64,
               max_pos=16, n_classes=3)

    key = jax.random.PRNGKey(0)
    pkey, ikey = jax.random.split(key)
    params = init_params(pkey, cfg)

    B, S = 2, 8
    input_ids = jax.random.randint(ikey, (B, S), 0, cfg["vocab"], dtype=jnp.int32)
    attention_mask = jnp.concatenate(
        [jnp.ones((B, 6), jnp.int32), jnp.zeros((B, 2), jnp.int32)], axis=1)

    fwd = jax.jit(lambda p, ids, m: sentiment_classifier_forward(p, ids, m, cfg))
    logits = fwd(params, input_ids, attention_mask)
    jax.block_until_ready(logits)
    assert logits.shape == (B, cfg["n_classes"])
    assert logits.dtype == jnp.float32
    print("KERNEL_OK")
</pallas_src>

<mosaic_0001>
module attributes {stable_mosaic.version = 11 : i64} {
  func.func @_linear_kernel(%arg0: i32, %arg1: i32, %arg2: memref<16x32xbf16, #tpu.memory_space<vmem>>, %arg3: memref<32x96xbf16, #tpu.memory_space<vmem>>, %arg4: memref<1x96xf32, #tpu.memory_space<vmem>>, %arg5: memref<16x96xbf16, #tpu.memory_space<vmem>>) attributes {dimension_semantics = [#tpu.dimension_semantics<parallel>, #tpu.dimension_semantics<parallel>], iteration_bounds = array<i64: 1, 1>, scalar_prefetch = 0 : i64, scratch_operands = 0 : i64, tpu.core_type = #tpu.core_type<tc>, window_params = [{transform_indices = @transform_0, window_bounds = array<i64: 16, 32>}, {transform_indices = @transform_1, window_bounds = array<i64: 32, 96>}, {transform_indices = @transform_2, window_bounds = array<i64: 1, 96>}, {transform_indices = @transform_3, window_bounds = array<i64: 16, 96>}]} {
    %c0 = arith.constant 0 : index
    %c0_0 = arith.constant 0 : index
    %0 = vector.load %arg2[%c0, %c0_0] : memref<16x32xbf16, #tpu.memory_space<vmem>>, vector<16x32xbf16>
    %c0_1 = arith.constant 0 : index
    %c0_2 = arith.constant 0 : index
    %1 = vector.load %arg3[%c0_1, %c0_2] : memref<32x96xbf16, #tpu.memory_space<vmem>>, vector<32x96xbf16>
    %cst = arith.constant dense<0.000000e+00> : vector<16x96xf32>
    %2 = tpu.matmul %0, %1, %cst {dimension_numbers = #tpu.dot_dimension_numbers<[1], [0], [0], [1], [0, 0, 1, 1], [], []>} : vector<16x32xbf16>, vector<32x96xbf16>, vector<16x96xf32> -> vector<16x96xf32>
    %c0_3 = arith.constant 0 : index
    %c0_4 = arith.constant 0 : index
    %3 = vector.load %arg4[%c0_3, %c0_4] : memref<1x96xf32, #tpu.memory_space<vmem>>, vector<1x96xf32>
    %4 = vector.broadcast %3 : vector<1x96xf32> to vector<16x96xf32>
    %5 = arith.addf %2, %4 : vector<16x96xf32>
    %6 = arith.truncf %5 : vector<16x96xf32> to vector<16x96xbf16>
    %c0_5 = arith.constant 0 : index
    %c0_6 = arith.constant 0 : index
    %7 = vector.load %arg5[%c0_5, %c0_6] : memref<16x96xbf16, #tpu.memory_space<vmem>>, vector<16x96xbf16>
    tpu.vector_store %arg5[%c0_5, %c0_6], %6 {strides = array<i32>} : memref<16x96xbf16, #tpu.memory_space<vmem>>, vector<16x96xbf16>,
    return
  }
  func.func @transform_0(%arg0: i32, %arg1: i32) -> (i32, i32) {
    %c0_i32 = arith.constant 0 : i32
    %c0_i32_0 = arith.constant 0 : i32
    return %arg0, %c0_i32 : i32, i32
  }
  func.func @transform_1(%arg0: i32, %arg1: i32) -> (i32, i32) {
    %c0_i32 = arith.constant 0 : i32
    %c0_i32_0 = arith.constant 0 : i32
    return %c0_i32, %arg1 : i32, i32
  }
  func.func @transform_2(%arg0: i32, %arg1: i32) -> (i32, i32) {
    %c0_i32 = arith.constant 0 : i32
    %c0_i32_0 = arith.constant 0 : i32
    return %c0_i32, %arg1 : i32, i32
  }
  func.func @transform_3(%arg0: i32, %arg1: i32) -> (i32, i32) {
    %c0_i32 = arith.constant 0 : i32
    return %arg0, %arg1 : i32, i32
  }
}

module attributes {stable_mosaic.version = 11 : i64} {
  func.func @_embed_ln_kernel(%arg0: i32, %arg1: memref<8x32xbf16, #tpu.memory_space<vmem>>, %arg2: memref<8x32xbf16, #tpu.memory_space<vmem>>, %arg3: memref<1x32xbf16, #tpu.memory_space<vmem>>, %arg4: memref<1x32xf32, #tpu.memory_space<vmem>>, %arg5: memref<1x32xf32, #tpu.memory_space<vmem>>, %arg6: memref<8x32xbf16, #tpu.memory_space<vmem>>) attributes {dimension_semantics = [#tpu.dimension_semantics<parallel>], iteration_bounds = array<i64: 2>, scalar_prefetch = 0 : i64, scratch_operands = 0 : i64, tpu.core_type = #tpu.core_type<tc>, window_params = [{transform_indices = @transform_0, window_bounds = array<i64: 8, 32>}, {pipeline_mode = #tpu.pipeline_mode<synchronous>, transform_indices = @transform_1, window_bounds = array<i64: 8, 32>}, {pipeline_mode = #tpu.pipeline_mode<synchronous>, transform_indices = @transform_2, window_bounds = array<i64: 1, 32>}, {pipeline_mode = #tpu.pipeline_mode<synchronous>, transform_indices = @transform_3, window_bounds = array<i64: 1, 32>}, {pipeline_mode = #tpu.pipeline_mode<synchronous>, transform_indices = @transform_4, window_bounds = array<i64: 1, 32>}, {transform_indices = @transform_5, window_bounds = array<i64: 8, 32>}]} {
    %c0 = arith.constant 0 : index
    %c0_0 = arith.constant 0 : index
    %0 = vector.load %arg1[%c0, %c0_0] : memref<8x32xbf16, #tpu.memory_space<vmem>>, vector<8x32xbf16>
    %1 = arith.extf %0 : vector<8x32xbf16> to vector<8x32xf32>
    %c0_1 = arith.constant 0 : index
    %c0_2 = arith.constant 0 : index
    %2 = vector.load %arg2[%c0_1, %c0_2] : memref<8x32xbf16, #tpu.memory_space<vmem>>, vector<8x32xbf16>
    %3 = arith.extf %2 : vector<8x32xbf16> to vector<8x32xf32>
    %4 = arith.addf %1, %3 : vector<8x32xf32>
    %c0_3 = arith.constant 0 : index
    %c0_4 = arith.constant 0 : index
    %5 = vector.load %arg3[%c0_3, %c0_4] : memref<1x32xbf16, #tpu.memory_space<vmem>>, vector<1x32xbf16>
    %6 = arith.extf %5 : vector<1x32xbf16> to vector<1x32xf32>
    %7 = vector.broadcast %6 : vector<1x32xf32> to vector<8x32xf32>
    %8 = arith.addf %4, %7 : vector<8x32xf32>
    %cst = arith.constant dense<0.000000e+00> : vector<8xf32>
    %9 = vector.multi_reduction <add>, %8, %cst [1] : vector<8x32xf32> to vector<8xf32>
    %10 = vector.shape_cast %9 : vector<8xf32> to vector<8x1xf32>
    %cst_5 = arith.constant 3.200000e+01 : f32
    %11 = vector.broadcast %cst_5 : f32 to vector<8x1xf32>
    %12 = arith.divf %10, %11 : vector<8x1xf32>
    %13 = vector.broadcast %12 : vector<8x1xf32> to vector<8x32xf32>
    %14 = arith.subf %8, %13 : vector<8x32xf32>
    %15 = arith.mulf %14, %14 : vector<8x32xf32>
    %cst_6 = arith.constant dense<0.000000e+00> : vector<8xf32>
    %16 = vector.multi_reduction <add>, %15, %cst_6 [1] : vector<8x32xf32> to vector<8xf32>
    %17 = vector.shape_cast %16 : vector<8xf32> to vector<8x1xf32>
    %cst_7 = arith.constant 3.200000e+01 : f32
    %18 = vector.broadcast %cst_7 : f32 to vector<8x1xf32>
    %19 = arith.divf %17, %18 : vector<8x1xf32>
    %20 = vector.broadcast %12 : vector<8x1xf32> to vector<8x32xf32>
    %21 = arith.subf %8, %20 : vector<8x32xf32>
    %cst_8 = arith.constant 9.99999996E-13 : f32
    %22 = vector.broadcast %cst_8 : f32 to vector<8x1xf32>
    %23 = arith.addf %19, %22 : vector<8x1xf32>
    %24 = math.rsqrt %23 : vector<8x1xf32>
    %25 = vector.broadcast %24 : vector<8x1xf32> to vector<8x32xf32>
    %26 = arith.mulf %21, %25 : vector<8x32xf32>
    %c0_9 = arith.constant 0 : index
    %c0_10 = arith.constant 0 : index
    %27 = vector.load %arg4[%c0_9, %c0_10] : memref<1x32xf32, #tpu.memory_space<vmem>>, vector<1x32xf32>
    %28 = vector.broadcast %27 : vector<1x32xf32> to vector<8x32xf32>
    %29 = arith.mulf %26, %28 : vector<8x32xf32>
    %c0_11 = arith.constant 0 : index
    %c0_12 = arith.constant 0 : index
    %30 = vector.load %arg5[%c0_11, %c0_12] : memref<1x32xf32, #tpu.memory_space<vmem>>, vector<1x32xf32>
    %31 = vector.broadcast %30 : vector<1x32xf32> to vector<8x32xf32>
    %32 = arith.addf %29, %31 : vector<8x32xf32>
    %33 = arith.truncf %32 : vector<8x32xf32> to vector<8x32xbf16>
    %c0_13 = arith.constant 0 : index
    %c0_14 = arith.constant 0 : index
    %34 = vector.load %arg6[%c0_13, %c0_14] : memref<8x32xbf16, #tpu.memory_space<vmem>>, vector<8x32xbf16>
    tpu.vector_store %arg6[%c0_13, %c0_14], %33 {strides = array<i32>} : memref<8x32xbf16, #tpu.memory_space<vmem>>, vector<8x32xbf16>,
    return
  }
  func.func @transform_0(%arg0: i32) -> (i32, i32) {
    %c0_i32 = arith.constant 0 : i32
    %c0_i32_0 = arith.constant 0 : i32
    return %arg0, %c0_i32 : i32, i32
  }
  func.func @transform_1(%arg0: i32) -> (i32, i32) {
    %c0_i32 = arith.constant 0 : i32
    %c0_i32_0 = arith.constant 0 : i32
    %c0_i32_1 = arith.constant 0 : i32
    return %c0_i32, %c0_i32_0 : i32, i32
  }
  func.func @transform_2(%arg0: i32) -> (i32, i32) {
    %c0_i32 = arith.constant 0 : i32
    %c0_i32_0 = arith.constant 0 : i32
    %c0_i32_1 = arith.constant 0 : i32
    return %c0_i32, %c0_i32_0 : i32, i32
  }
  func.func @transform_3(%arg0: i32) -> (i32, i32) {
    %c0_i32 = arith.constant 0 : i32
    %c0_i32_0 = arith.constant 0 : i32
    %c0_i32_1 = arith.constant 0 : i32
    return %c0_i32, %c0_i32_0 : i32, i32
  }
  func.func @transform_4(%arg0: i32) -> (i32, i32) {
    %c0_i32 = arith.constant 0 : i32
    %c0_i32_0 = arith.constant 0 : i32
    %c0_i32_1 = arith.constant 0 : i32
    return %c0_i32, %c0_i32_0 : i32, i32
  }
  func.func @transform_5(%arg0: i32) -> (i32, i32) {
    %c0_i32 = arith.constant 0 : i32
    %c0_i32_0 = arith.constant 0 : i32
    return %arg0, %c0_i32 : i32, i32
  }
}

module attributes {stable_mosaic.version = 11 : i64} {
  func.func @_attention_kernel(%arg0: i32, %arg1: memref<8x96xbf16, #tpu.memory_space<vmem>>, %arg2: memref<1x1x8xf32, #tpu.memory_space<vmem>>, %arg3: memref<8x32xbf16, #tpu.memory_space<vmem>>) attributes {dimension_semantics = [#tpu.dimension_semantics<parallel>], iteration_bounds = array<i64: 2>, scalar_prefetch = 0 : i64, scratch_operands = 0 : i64, tpu.core_type = #tpu.core_type<tc>, window_params = [{transform_indices = @transform_0, window_bounds = array<i64: 8, 96>}, {transform_indices = @transform_1, window_bounds = array<i64: 1, 1, 8>}, {transform_indices = @transform_2, window_bounds = array<i64: 8, 32>}]} {
    %c0 = arith.constant 0 : index
    %c0_0 = arith.constant 0 : index
    %c0_1 = arith.constant 0 : index
    %0 = vector.load %arg2[%c0, %c0_0, %c0_1] : memref<1x1x8xf32, #tpu.memory_space<vmem>>, vector<1x1x8xf32>
    %1 = vector.shape_cast %0 : vector<1x1x8xf32> to vector<1x8xf32>
    %c0_2 = arith.constant 0 : index
    %c0_3 = arith.constant 0 : index
    %2 = vector.load %arg1[%c0_2, %c0_3] : memref<8x96xbf16, #tpu.memory_space<vmem>>, vector<8x16xbf16>
    %c0_4 = arith.constant 0 : index
    %c32 = arith.constant 32 : index
    %3 = vector.load %arg1[%c0_4, %c32] : memref<8x96xbf16, #tpu.memory_space<vmem>>, vector<8x16xbf16>
    %c0_5 = arith.constant 0 : index
    %c64 = arith.constant 64 : index
    %4 = vector.load %arg1[%c0_5, %c64] : memref<8x96xbf16, #tpu.memory_space<vmem>>, vector<8x16xbf16>
    %cst = arith.constant dense<0.000000e+00> : vector<8x8xf32>
    %5 = tpu.matmul %2, %3, %cst {dimension_numbers = #tpu.dot_dimension_numbers<[1], [1], [0], [0], [0, 0, 1, 0], [], []>} : vector<8x16xbf16>, vector<8x16xbf16>, vector<8x8xf32> -> vector<8x8xf32>
    %6 = vector.broadcast %1 : vector<1x8xf32> to vector<8x8xf32>
    %7 = arith.addf %5, %6 : vector<8x8xf32>
    %cst_6 = arith.constant dense<0xFF800000> : vector<8xf32>
    %8 = vector.multi_reduction <maximumf>, %7, %cst_6 [1] : vector<8x8xf32> to vector<8xf32>
    %9 = vector.shape_cast %8 : vector<8xf32> to vector<8x1xf32>
    %10 = vector.broadcast %9 : vector<8x1xf32> to vector<8x8xf32>
    %11 = arith.subf %7, %10 : vector<8x8xf32>
    %12 = math.exp %11 : vector<8x8xf32>
    %cst_7 = arith.constant dense<0.000000e+00> : vector<8xf32>
    %13 = vector.multi_reduction <add>, %12, %cst_7 [1] : vector<8x8xf32> to vector<8xf32>
    %14 = vector.shape_cast %13 : vector<8xf32> to vector<8x1xf32>
    %15 = tpu.reciprocal %14 {approx = true} : vector<8x1xf32> -> vector<8x1xf32>
    %16 = vector.broadcast %15 : vector<8x1xf32> to vector<8x8xf32>
    %17 = arith.mulf %12, %16 : vector<8x8xf32>
    %18 = arith.truncf %17 : vector<8x8xf32> to vector<8x8xbf16>
    %cst_8 = arith.constant dense<0.000000e+00> : vector<8x16xf32>
    %19 = tpu.matmul %18, %4, %cst_8 {dimension_numbers = #tpu.dot_dimension_numbers<[1], [0], [0], [1], [0, 0, 1, 1], [], []>} : vector<8x8xbf16>, vector<8x16xbf16>, vector<8x16xf32> -> vector<8x16xf32>
    %c0_9 = arith.constant 0 : index
    %c16 = arith.constant 16 : index
    %20 = vector.load %arg1[%c0_9, %c16] : memref<8x96xbf16, #tpu.memory_space<vmem>>, vector<8x16xbf16>
    %c0_10 = arith.constant 0 : index
    %c48 = arith.constant 48 : index
    %21 = vector.load %arg1[%c0_10, %c48] : memref<8x96xbf16, #tpu.memory_space<vmem>>, vector<8x16xbf16>
    %c0_11 = arith.constant 0 : index
    %c80 = arith.constant 80 : index
    %22 = vector.load %arg1[%c0_11, %c80] : memref<8x96xbf16, #tpu.memory_space<vmem>>, vector<8x16xbf16>
    %cst_12 = arith.constant dense<0.000000e+00> : vector<8x8xf32>
    %23 = tpu.matmul %20, %21, %cst_12 {dimension_numbers = #tpu.dot_dimension_numbers<[1], [1], [0], [0], [0, 0, 1, 0], [], []>} : vector<8x16xbf16>, vector<8x16xbf16>, vector<8x8xf32> -> vector<8x8xf32>
    %24 = vector.broadcast %1 : vector<1x8xf32> to vector<8x8xf32>
    %25 = arith.addf %23, %24 : vector<8x8xf32>
    %cst_13 = arith.constant dense<0xFF800000> : vector<8xf32>
    %26 = vector.multi_reduction <maximumf>, %25, %cst_13 [1] : vector<8x8xf32> to vector<8xf32>
    %27 = vector.shape_cast %26 : vector<8xf32> to vector<8x1xf32>
    %28 = vector.broadcast %27 : vector<8x1xf32> to vector<8x8xf32>
    %29 = arith.subf %25, %28 : vector<8x8xf32>
    %30 = math.exp %29 : vector<8x8xf32>
    %cst_14 = arith.constant dense<0.000000e+00> : vector<8xf32>
    %31 = vector.multi_reduction <add>, %30, %cst_14 [1] : vector<8x8xf32> to vector<8xf32>
    %32 = vector.shape_cast %31 : vector<8xf32> to vector<8x1xf32>
    %33 = tpu.reciprocal %32 {approx = true} : vector<8x1xf32> -> vector<8x1xf32>
    %34 = vector.broadcast %33 : vector<8x1xf32> to vector<8x8xf32>
    %35 = arith.mulf %30, %34 : vector<8x8xf32>
    %36 = arith.truncf %35 : vector<8x8xf32> to vector<8x8xbf16>
    %cst_15 = arith.constant dense<0.000000e+00> : vector<8x16xf32>
    %37 = tpu.matmul %36, %22, %cst_15 {dimension_numbers = #tpu.dot_dimension_numbers<[1], [0], [0], [1], [0, 0, 1, 1], [], []>} : vector<8x8xbf16>, vector<8x16xbf16>, vector<8x16xf32> -> vector<8x16xf32>
    %38 = tpu.concatenate %19, %37 in 1 : vector<8x16xf32>, vector<8x16xf32> -> vector<8x32xf32>
    %39 = arith.truncf %38 : vector<8x32xf32> to vector<8x32xbf16>
    %c0_16 = arith.constant 0 : index
    %c0_17 = arith.constant 0 : index
    %40 = vector.load %arg3[%c0_16, %c0_17] : memref<8x32xbf16, #tpu.memory_space<vmem>>, vector<8x32xbf16>
    tpu.vector_store %arg3[%c0_16, %c0_17], %39 {strides = array<i32>} : memref<8x32xbf16, #tpu.memory_space<vmem>>, vector<8x32xbf16>,
    return
  }
  func.func @transform_0(%arg0: i32) -> (i32, i32) {
    %c0_i32 = arith.constant 0 : i32
    %c0_i32_0 = arith.constant 0 : i32
    return %arg0, %c0_i32 : i32, i32
  }
  func.func @transform_1(%arg0: i32) -> (i32, i32, i32) {
    %c0_i32 = arith.constant 0 : i32
    %c0_i32_0 = arith.constant 0 : i32
    %c0_i32_1 = arith.constant 0 : i32
    return %arg0, %c0_i32, %c0_i32_0 : i32, i32, i32
  }
  func.func @transform_2(%arg0: i32) -> (i32, i32) {
    %c0_i32 = arith.constant 0 : i32
    %c0_i32_0 = arith.constant 0 : i32
    return %arg0, %c0_i32 : i32, i32
  }
}

module attributes {stable_mosaic.version = 11 : i64} {
  func.func @_matmul_add_ln_kernel(%arg0: i32, %arg1: memref<16x32xbf16, #tpu.memory_space<vmem>>, %arg2: memref<32x32xbf16, #tpu.memory_space<vmem>>, %arg3: memref<1x32xf32, #tpu.memory_space<vmem>>, %arg4: memref<16x32xbf16, #tpu.memory_space<vmem>>, %arg5: memref<1x32xf32, #tpu.memory_space<vmem>>, %arg6: memref<1x32xf32, #tpu.memory_space<vmem>>, %arg7: memref<16x32xbf16, #tpu.memory_space<vmem>>) attributes {dimension_semantics = [#tpu.dimension_semantics<parallel>], iteration_bounds = array<i64: 1>, scalar_prefetch = 0 : i64, scratch_operands = 0 : i64, tpu.core_type = #tpu.core_type<tc>, window_params = [{transform_indices = @transform_0, window_bounds = array<i64: 16, 32>}, {pipeline_mode = #tpu.pipeline_mode<synchronous>, transform_indices = @transform_1, window_bounds = array<i64: 32, 32>}, {pipeline_mode = #tpu.pipeline_mode<synchronous>, transform_indices = @transform_2, window_bounds = array<i64: 1, 32>}, {transform_indices = @transform_3, window_bounds = array<i64: 16, 32>}, {pipeline_mode = #tpu.pipeline_mode<synchronous>, transform_indices = @transform_4, window_bounds = array<i64: 1, 32>}, {pipeline_mode = #tpu.pipeline_mode<synchronous>, transform_indices = @transform_5, window_bounds = array<i64: 1, 32>}, {transform_indices = @transform_6, window_bounds = array<i64: 16, 32>}]} {
    %c0 = arith.constant 0 : index
    %c0_0 = arith.constant 0 : index
    %0 = vector.load %arg1[%c0, %c0_0] : memref<16x32xbf16, #tpu.memory_space<vmem>>, vector<16x32xbf16>
    %c0_1 = arith.constant 0 : index
    %c0_2 = arith.constant 0 : index
    %1 = vector.load %arg2[%c0_1, %c0_2] : memref<32x32xbf16, #tpu.memory_space<vmem>>, vector<32x32xbf16>
    %cst = arith.constant dense<0.000000e+00> : vector<16x32xf32>
    %2 = tpu.matmul %0, %1, %cst {dimension_numbers = #tpu.dot_dimension_numbers<[1], [0], [0], [1], [0, 0, 1, 1], [], []>} : vector<16x32xbf16>, vector<32x32xbf16>, vector<16x32xf32> -> vector<16x32xf32>
    %c0_3 = arith.constant 0 : index
    %c0_4 = arith.constant 0 : index
    %3 = vector.load %arg3[%c0_3, %c0_4] : memref<1x32xf32, #tpu.memory_space<vmem>>, vector<1x32xf32>
    %4 = vector.broadcast %3 : vector<1x32xf32> to vector<16x32xf32>
    %5 = arith.addf %2, %4 : vector<16x32xf32>
    %c0_5 = arith.constant 0 : index
    %c0_6 = arith.constant 0 : index
    %6 = vector.load %arg4[%c0_5, %c0_6] : memref<16x32xbf16, #tpu.memory_space<vmem>>, vector<16x32xbf16>
    %7 = arith.extf %6 : vector<16x32xbf16> to vector<16x32xf32>
    %8 = arith.addf %5, %7 : vector<16x32xf32>
    %cst_7 = arith.constant dense<0.000000e+00> : vector<16xf32>
    %9 = vector.multi_reduction <add>, %8, %cst_7 [1] : vector<16x32xf32> to vector<16xf32>
    %10 = vector.shape_cast %9 : vector<16xf32> to vector<16x1xf32>
    %cst_8 = arith.constant 3.200000e+01 : f32
    %11 = vector.broadcast %cst_8 : f32 to vector<16x1xf32>
    %12 = arith.divf %10, %11 : vector<16x1xf32>
    %13 = vector.broadcast %12 : vector<16x1xf32> to vector<16x32xf32>
    %14 = arith.subf %8, %13 : vector<16x32xf32>
    %15 = arith.mulf %14, %14 : vector<16x32xf32>
    %cst_9 = arith.constant dense<0.000000e+00> : vector<16xf32>
    %16 = vector.multi_reduction <add>, %15, %cst_9 [1] : vector<16x32xf32> to vector<16xf32>
    %17 = vector.shape_cast %16 : vector<16xf32> to vector<16x1xf32>
    %cst_10 = arith.constant 3.200000e+01 : f32
    %18 = vector.broadcast %cst_10 : f32 to vector<16x1xf32>
    %19 = arith.divf %17, %18 : vector<16x1xf32>
    %20 = vector.broadcast %12 : vector<16x1xf32> to vector<16x32xf32>
    %21 = arith.subf %8, %20 : vector<16x32xf32>
    %cst_11 = arith.constant 9.99999996E-13 : f32
    %22 = vector.broadcast %cst_11 : f32 to vector<16x1xf32>
    %23 = arith.addf %19, %22 : vector<16x1xf32>
    %24 = math.rsqrt %23 : vector<16x1xf32>
    %25 = vector.broadcast %24 : vector<16x1xf32> to vector<16x32xf32>
    %26 = arith.mulf %21, %25 : vector<16x32xf32>
    %c0_12 = arith.constant 0 : index
    %c0_13 = arith.constant 0 : index
    %27 = vector.load %arg5[%c0_12, %c0_13] : memref<1x32xf32, #tpu.memory_space<vmem>>, vector<1x32xf32>
    %28 = vector.broadcast %27 : vector<1x32xf32> to vector<16x32xf32>
    %29 = arith.mulf %26, %28 : vector<16x32xf32>
    %c0_14 = arith.constant 0 : index
    %c0_15 = arith.constant 0 : index
    %30 = vector.load %arg6[%c0_14, %c0_15] : memref<1x32xf32, #tpu.memory_space<vmem>>, vector<1x32xf32>
    %31 = vector.broadcast %30 : vector<1x32xf32> to vector<16x32xf32>
    %32 = arith.addf %29, %31 : vector<16x32xf32>
    %33 = arith.truncf %32 : vector<16x32xf32> to vector<16x32xbf16>
    %c0_16 = arith.constant 0 : index
    %c0_17 = arith.constant 0 : index
    %34 = vector.load %arg7[%c0_16, %c0_17] : memref<16x32xbf16, #tpu.memory_space<vmem>>, vector<16x32xbf16>
    tpu.vector_store %arg7[%c0_16, %c0_17], %33 {strides = array<i32>} : memref<16x32xbf16, #tpu.memory_space<vmem>>, vector<16x32xbf16>,
    return
  }
  func.func @transform_0(%arg0: i32) -> (i32, i32) {
    %c0_i32 = arith.constant 0 : i32
    %c0_i32_0 = arith.constant 0 : i32
    return %arg0, %c0_i32 : i32, i32
  }
  func.func @transform_1(%arg0: i32) -> (i32, i32) {
    %c0_i32 = arith.constant 0 : i32
    %c0_i32_0 = arith.constant 0 : i32
    %c0_i32_1 = arith.constant 0 : i32
    return %c0_i32, %c0_i32_0 : i32, i32
  }
  func.func @transform_2(%arg0: i32) -> (i32, i32) {
    %c0_i32 = arith.constant 0 : i32
    %c0_i32_0 = arith.constant 0 : i32
    %c0_i32_1 = arith.constant 0 : i32
    return %c0_i32, %c0_i32_0 : i32, i32
  }
  func.func @transform_3(%arg0: i32) -> (i32, i32) {
    %c0_i32 = arith.constant 0 : i32
    %c0_i32_0 = arith.constant 0 : i32
    return %arg0, %c0_i32 : i32, i32
  }
  func.func @transform_4(%arg0: i32) -> (i32, i32) {
    %c0_i32 = arith.constant 0 : i32
    %c0_i32_0 = arith.constant 0 : i32
    %c0_i32_1 = arith.constant 0 : i32
    return %c0_i32, %c0_i32_0 : i32, i32
  }
  func.func @transform_5(%arg0: i32) -> (i32, i32) {
    %c0_i32 = arith.constant 0 : i32
    %c0_i32_0 = arith.constant 0 : i32
    %c0_i32_1 = arith.constant 0 : i32
    return %c0_i32, %c0_i32_0 : i32, i32
  }
  func.func @transform_6(%arg0: i32) -> (i32, i32) {
    %c0_i32 = arith.constant 0 : i32
    %c0_i32_0 = arith.constant 0 : i32
    return %arg0, %c0_i32 : i32, i32
  }
}

module attributes {stable_mosaic.version = 11 : i64} {
  func.func @_linear_kernel(%arg0: i32, %arg1: i32, %arg2: memref<16x32xbf16, #tpu.memory_space<vmem>>, %arg3: memref<32x64xbf16, #tpu.memory_space<vmem>>, %arg4: memref<1x64xf32, #tpu.memory_space<vmem>>, %arg5: memref<16x64xbf16, #tpu.memory_space<vmem>>) attributes {dimension_semantics = [#tpu.dimension_semantics<parallel>, #tpu.dimension_semantics<parallel>], iteration_bounds = array<i64: 1, 1>, scalar_prefetch = 0 : i64, scratch_operands = 0 : i64, tpu.core_type = #tpu.core_type<tc>, window_params = [{transform_indices = @transform_0, window_bounds = array<i64: 16, 32>}, {transform_indices = @transform_1, window_bounds = array<i64: 32, 64>}, {transform_indices = @transform_2, window_bounds = array<i64: 1, 64>}, {transform_indices = @transform_3, window_bounds = array<i64: 16, 64>}]} {
    %c0 = arith.constant 0 : index
    %c0_0 = arith.constant 0 : index
    %0 = vector.load %arg2[%c0, %c0_0] : memref<16x32xbf16, #tpu.memory_space<vmem>>, vector<16x32xbf16>
    %c0_1 = arith.constant 0 : index
    %c0_2 = arith.constant 0 : index
    %1 = vector.load %arg3[%c0_1, %c0_2] : memref<32x64xbf16, #tpu.memory_space<vmem>>, vector<32x64xbf16>
    %cst = arith.constant dense<0.000000e+00> : vector<16x64xf32>
    %2 = tpu.matmul %0, %1, %cst {dimension_numbers = #tpu.dot_dimension_numbers<[1], [0], [0], [1], [0, 0, 1, 1], [], []>} : vector<16x32xbf16>, vector<32x64xbf16>, vector<16x64xf32> -> vector<16x64xf32>
    %c0_3 = arith.constant 0 : index
    %c0_4 = arith.constant 0 : index
    %3 = vector.load %arg4[%c0_3, %c0_4] : memref<1x64xf32, #tpu.memory_space<vmem>>, vector<1x64xf32>
    %4 = vector.broadcast %3 : vector<1x64xf32> to vector<16x64xf32>
    %5 = arith.addf %2, %4 : vector<16x64xf32>
    %cst_5 = arith.constant 5.000000e-01 : f32
    %6 = vector.broadcast %cst_5 : f32 to vector<16x64xf32>
    %7 = arith.mulf %6, %5 : vector<16x64xf32>
    %cst_6 = arith.constant 4.471500e-02 : f32
    %8 = vector.broadcast %cst_6 : f32 to vector<16x64xf32>
    %9 = arith.mulf %8, %5 : vector<16x64xf32>
    %10 = arith.mulf %9, %5 : vector<16x64xf32>
    %11 = arith.mulf %10, %5 : vector<16x64xf32>
    %12 = arith.addf %5, %11 : vector<16x64xf32>
    %cst_7 = arith.constant 0.797884583 : f32
    %13 = vector.broadcast %cst_7 : f32 to vector<16x64xf32>
    %14 = arith.mulf %13, %12 : vector<16x64xf32>
    %15 = math.tanh %14 : vector<16x64xf32>
    %cst_8 = arith.constant 1.000000e+00 : f32
    %16 = vector.broadcast %cst_8 : f32 to vector<16x64xf32>
    %17 = arith.addf %16, %15 : vector<16x64xf32>
    %18 = arith.mulf %7, %17 : vector<16x64xf32>
    %19 = arith.truncf %18 : vector<16x64xf32> to vector<16x64xbf16>
    %c0_9 = arith.constant 0 : index
    %c0_10 = arith.constant 0 : index
    %20 = vector.load %arg5[%c0_9, %c0_10] : memref<16x64xbf16, #tpu.memory_space<vmem>>, vector<16x64xbf16>
    tpu.vector_store %arg5[%c0_9, %c0_10], %19 {strides = array<i32>} : memref<16x64xbf16, #tpu.memory_space<vmem>>, vector<16x64xbf16>,
    return
  }
  func.func @transform_0(%arg0: i32, %arg1: i32) -> (i32, i32) {
    %c0_i32 = arith.constant 0 : i32
    %c0_i32_0 = arith.constant 0 : i32
    return %arg0, %c0_i32 : i32, i32
  }
  func.func @transform_1(%arg0: i32, %arg1: i32) -> (i32, i32) {
    %c0_i32 = arith.constant 0 : i32
    %c0_i32_0 = arith.constant 0 : i32
    return %c0_i32, %arg1 : i32, i32
  }
  func.func @transform_2(%arg0: i32, %arg1: i32) -> (i32, i32) {
    %c0_i32 = arith.constant 0 : i32
    %c0_i32_0 = arith.constant 0 : i32
    return %c0_i32, %arg1 : i32, i32
  }
  func.func @transform_3(%arg0: i32, %arg1: i32) -> (i32, i32) {
    %c0_i32 = arith.constant 0 : i32
    return %arg0, %arg1 : i32, i32
  }
}

module attributes {stable_mosaic.version = 11 : i64} {
  func.func @_matmul_add_ln_kernel(%arg0: i32, %arg1: memref<16x64xbf16, #tpu.memory_space<vmem>>, %arg2: memref<64x32xbf16, #tpu.memory_space<vmem>>, %arg3: memref<1x32xf32, #tpu.memory_space<vmem>>, %arg4: memref<16x32xbf16, #tpu.memory_space<vmem>>, %arg5: memref<1x32xf32, #tpu.memory_space<vmem>>, %arg6: memref<1x32xf32, #tpu.memory_space<vmem>>, %arg7: memref<16x32xbf16, #tpu.memory_space<vmem>>) attributes {dimension_semantics = [#tpu.dimension_semantics<parallel>], iteration_bounds = array<i64: 1>, scalar_prefetch = 0 : i64, scratch_operands = 0 : i64, tpu.core_type = #tpu.core_type<tc>, window_params = [{transform_indices = @transform_0, window_bounds = array<i64: 16, 64>}, {pipeline_mode = #tpu.pipeline_mode<synchronous>, transform_indices = @transform_1, window_bounds = array<i64: 64, 32>}, {pipeline_mode = #tpu.pipeline_mode<synchronous>, transform_indices = @transform_2, window_bounds = array<i64: 1, 32>}, {transform_indices = @transform_3, window_bounds = array<i64: 16, 32>}, {pipeline_mode = #tpu.pipeline_mode<synchronous>, transform_indices = @transform_4, window_bounds = array<i64: 1, 32>}, {pipeline_mode = #tpu.pipeline_mode<synchronous>, transform_indices = @transform_5, window_bounds = array<i64: 1, 32>}, {transform_indices = @transform_6, window_bounds = array<i64: 16, 32>}]} {
    %c0 = arith.constant 0 : index
    %c0_0 = arith.constant 0 : index
    %0 = vector.load %arg1[%c0, %c0_0] : memref<16x64xbf16, #tpu.memory_space<vmem>>, vector<16x64xbf16>
    %c0_1 = arith.constant 0 : index
    %c0_2 = arith.constant 0 : index
    %1 = vector.load %arg2[%c0_1, %c0_2] : memref<64x32xbf16, #tpu.memory_space<vmem>>, vector<64x32xbf16>
    %cst = arith.constant dense<0.000000e+00> : vector<16x32xf32>
    %2 = tpu.matmul %0, %1, %cst {dimension_numbers = #tpu.dot_dimension_numbers<[1], [0], [0], [1], [0, 0, 1, 1], [], []>} : vector<16x64xbf16>, vector<64x32xbf16>, vector<16x32xf32> -> vector<16x32xf32>
    %c0_3 = arith.constant 0 : index
    %c0_4 = arith.constant 0 : index
    %3 = vector.load %arg3[%c0_3, %c0_4] : memref<1x32xf32, #tpu.memory_space<vmem>>, vector<1x32xf32>
    %4 = vector.broadcast %3 : vector<1x32xf32> to vector<16x32xf32>
    %5 = arith.addf %2, %4 : vector<16x32xf32>
    %c0_5 = arith.constant 0 : index
    %c0_6 = arith.constant 0 : index
    %6 = vector.load %arg4[%c0_5, %c0_6] : memref<16x32xbf16, #tpu.memory_space<vmem>>, vector<16x32xbf16>
    %7 = arith.extf %6 : vector<16x32xbf16> to vector<16x32xf32>
    %8 = arith.addf %5, %7 : vector<16x32xf32>
    %cst_7 = arith.constant dense<0.000000e+00> : vector<16xf32>
    %9 = vector.multi_reduction <add>, %8, %cst_7 [1] : vector<16x32xf32> to vector<16xf32>
    %10 = vector.shape_cast %9 : vector<16xf32> to vector<16x1xf32>
    %cst_8 = arith.constant 3.200000e+01 : f32
    %11 = vector.broadcast %cst_8 : f32 to vector<16x1xf32>
    %12 = arith.divf %10, %11 : vector<16x1xf32>
    %13 = vector.broadcast %12 : vector<16x1xf32> to vector<16x32xf32>
    %14 = arith.subf %8, %13 : vector<16x32xf32>
    %15 = arith.mulf %14, %14 : vector<16x32xf32>
    %cst_9 = arith.constant dense<0.000000e+00> : vector<16xf32>
    %16 = vector.multi_reduction <add>, %15, %cst_9 [1] : vector<16x32xf32> to vector<16xf32>
    %17 = vector.shape_cast %16 : vector<16xf32> to vector<16x1xf32>
    %cst_10 = arith.constant 3.200000e+01 : f32
    %18 = vector.broadcast %cst_10 : f32 to vector<16x1xf32>
    %19 = arith.divf %17, %18 : vector<16x1xf32>
    %20 = vector.broadcast %12 : vector<16x1xf32> to vector<16x32xf32>
    %21 = arith.subf %8, %20 : vector<16x32xf32>
    %cst_11 = arith.constant 9.99999996E-13 : f32
    %22 = vector.broadcast %cst_11 : f32 to vector<16x1xf32>
    %23 = arith.addf %19, %22 : vector<16x1xf32>
    %24 = math.rsqrt %23 : vector<16x1xf32>
    %25 = vector.broadcast %24 : vector<16x1xf32> to vector<16x32xf32>
    %26 = arith.mulf %21, %25 : vector<16x32xf32>
    %c0_12 = arith.constant 0 : index
    %c0_13 = arith.constant 0 : index
    %27 = vector.load %arg5[%c0_12, %c0_13] : memref<1x32xf32, #tpu.memory_space<vmem>>, vector<1x32xf32>
    %28 = vector.broadcast %27 : vector<1x32xf32> to vector<16x32xf32>
    %29 = arith.mulf %26, %28 : vector<16x32xf32>
    %c0_14 = arith.constant 0 : index
    %c0_15 = arith.constant 0 : index
    %30 = vector.load %arg6[%c0_14, %c0_15] : memref<1x32xf32, #tpu.memory_space<vmem>>, vector<1x32xf32>
    %31 = vector.broadcast %30 : vector<1x32xf32> to vector<16x32xf32>
    %32 = arith.addf %29, %31 : vector<16x32xf32>
    %33 = arith.truncf %32 : vector<16x32xf32> to vector<16x32xbf16>
    %c0_16 = arith.constant 0 : index
    %c0_17 = arith.constant 0 : index
    %34 = vector.load %arg7[%c0_16, %c0_17] : memref<16x32xbf16, #tpu.memory_space<vmem>>, vector<16x32xbf16>
    tpu.vector_store %arg7[%c0_16, %c0_17], %33 {strides = array<i32>} : memref<16x32xbf16, #tpu.memory_space<vmem>>, vector<16x32xbf16>,
    return
  }
  func.func @transform_0(%arg0: i32) -> (i32, i32) {
    %c0_i32 = arith.constant 0 : i32
    %c0_i32_0 = arith.constant 0 : i32
    return %arg0, %c0_i32 : i32, i32
  }
  func.func @transform_1(%arg0: i32) -> (i32, i32) {
    %c0_i32 = arith.constant 0 : i32
    %c0_i32_0 = arith.constant 0 : i32
    %c0_i32_1 = arith.constant 0 : i32
    return %c0_i32, %c0_i32_0 : i32, i32
  }
  func.func @transform_2(%arg0: i32) -> (i32, i32) {
    %c0_i32 = arith.constant 0 : i32
    %c0_i32_0 = arith.constant 0 : i32
    %c0_i32_1 = arith.constant 0 : i32
    return %c0_i32, %c0_i32_0 : i32, i32
  }
  func.func @transform_3(%arg0: i32) -> (i32, i32) {
    %c0_i32 = arith.constant 0 : i32
    %c0_i32_0 = arith.constant 0 : i32
    return %arg0, %c0_i32 : i32, i32
  }
  func.func @transform_4(%arg0: i32) -> (i32, i32) {
    %c0_i32 = arith.constant 0 : i32
    %c0_i32_0 = arith.constant 0 : i32
    %c0_i32_1 = arith.constant 0 : i32
    return %c0_i32, %c0_i32_0 : i32, i32
  }
  func.func @transform_5(%arg0: i32) -> (i32, i32) {
    %c0_i32 = arith.constant 0 : i32
    %c0_i32_0 = arith.constant 0 : i32
    %c0_i32_1 = arith.constant 0 : i32
    return %c0_i32, %c0_i32_0 : i32, i32
  }
  func.func @transform_6(%arg0: i32) -> (i32, i32) {
    %c0_i32 = arith.constant 0 : i32
    %c0_i32_0 = arith.constant 0 : i32
    return %arg0, %c0_i32 : i32, i32
  }
}

module attributes {stable_mosaic.version = 11 : i64} {
  func.func @_head_kernel(%arg0: memref<2x32xbf16, #tpu.memory_space<vmem>>, %arg1: memref<32x32xbf16, #tpu.memory_space<vmem>>, %arg2: memref<1x32xf32, #tpu.memory_space<vmem>>, %arg3: memref<32x3xbf16, #tpu.memory_space<vmem>>, %arg4: memref<1x3xf32, #tpu.memory_space<vmem>>, %arg5: memref<2x3xf32, #tpu.memory_space<vmem>>) attributes {dimension_semantics = [], scalar_prefetch = 0 : i64, scratch_operands = 0 : i64, tpu.core_type = #tpu.core_type<tc>} {
    %c0 = arith.constant 0 : index
    %c0_0 = arith.constant 0 : index
    %0 = vector.load %arg0[%c0, %c0_0] : memref<2x32xbf16, #tpu.memory_space<vmem>>, vector<2x32xbf16>
    %c0_1 = arith.constant 0 : index
    %c0_2 = arith.constant 0 : index
    %1 = vector.load %arg1[%c0_1, %c0_2] : memref<32x32xbf16, #tpu.memory_space<vmem>>, vector<32x32xbf16>
    %cst = arith.constant dense<0.000000e+00> : vector<2x32xf32>
    %2 = tpu.matmul %0, %1, %cst {dimension_numbers = #tpu.dot_dimension_numbers<[1], [0], [0], [1], [0, 0, 1, 1], [], []>} : vector<2x32xbf16>, vector<32x32xbf16>, vector<2x32xf32> -> vector<2x32xf32>
    %c0_3 = arith.constant 0 : index
    %c0_4 = arith.constant 0 : index
    %3 = vector.load %arg2[%c0_3, %c0_4] : memref<1x32xf32, #tpu.memory_space<vmem>>, vector<1x32xf32>
    %4 = vector.broadcast %3 : vector<1x32xf32> to vector<2x32xf32>
    %5 = arith.addf %2, %4 : vector<2x32xf32>
    %6 = math.tanh %5 : vector<2x32xf32>
    %7 = arith.truncf %6 : vector<2x32xf32> to vector<2x32xbf16>
    %c0_5 = arith.constant 0 : index
    %c0_6 = arith.constant 0 : index
    %8 = vector.load %arg3[%c0_5, %c0_6] : memref<32x3xbf16, #tpu.memory_space<vmem>>, vector<32x3xbf16>
    %cst_7 = arith.constant dense<0.000000e+00> : vector<2x3xf32>
    %9 = tpu.matmul %7, %8, %cst_7 {dimension_numbers = #tpu.dot_dimension_numbers<[1], [0], [0], [1], [0, 0, 1, 1], [], []>} : vector<2x32xbf16>, vector<32x3xbf16>, vector<2x3xf32> -> vector<2x3xf32>
    %c0_8 = arith.constant 0 : index
    %c0_9 = arith.constant 0 : index
    %10 = vector.load %arg4[%c0_8, %c0_9] : memref<1x3xf32, #tpu.memory_space<vmem>>, vector<1x3xf32>
    %11 = vector.broadcast %10 : vector<1x3xf32> to vector<2x3xf32>
    %12 = arith.addf %9, %11 : vector<2x3xf32>
    %c0_10 = arith.constant 0 : index
    %c0_11 = arith.constant 0 : index
    %13 = vector.load %arg5[%c0_10, %c0_11] : memref<2x3xf32, #tpu.memory_space<vmem>>, vector<2x3xf32>
    tpu.vector_store %arg5[%c0_10, %c0_11], %12 {strides = array<i32>} : memref<2x3xf32, #tpu.memory_space<vmem>>, vector<2x3xf32>,
    return
  }
}

</mosaic_0001>

<bundles_post_ra>
// kernel: _lambda_.13
= control target key start
LH: loop header
LB: loop body
LE: loop exit
PB: predicated region body
PF: predicated region fallthrough
CT: control target
= control target key end

     0   :  { %vm42_vm0 = vcmask 261120   ;;  %vm62_vm1 = vcmask 781312   ;;  %s124_s1 = inlined_call_operand.vmem [shape: bf16[32,96], index: 1, kind: input, shape index: {}]   ;;  %s125_s2 = inlined_call_operand.vmem [shape: f32[1,96], index: 2, kind: input, shape index: {}]   ;;  %s126_s0 = inlined_call_operand.vmem [shape: bf16[16,32], index: 0, kind: input, shape index: {}]   ;;  %s127_s3 = inlined_call_operand.vmem [shape: bf16[16,96], index: 3, kind: output, shape index: {}]  }
   0x1   :  { %v84_v0 = vld [vmem:[%s124_s1 + $0x8] sm:$0xff]  ;;  %v83_v1 = vld [vmem:[%s124_s1] sm:$0xff] }
   0x2   :  { %52 = vmatpush.bf16.msra.mxu0 %v84_v0  ;;  %v82_v2 = vld [vmem:[%s126_s0] sm:$0xff] }
   0x3   :  { %v85_v3 = vld [vmem:[%s125_s2] ss:$0 sm:$0xff] }
   0x6   :  { %53 = vmatpush.bf16.msra.mxu0 %v83_v1 }
   0x9   :  { %81 = vmatmul.msk.bf16.vlgmr.msra.gmra.mxu0 %vm42_vm0, %v82_v2 }
  0x86   :  { %v55_v4 = vpop.f32.mrf.mxu0 }
  0x87   :  { %v56_v5 = vadd.f32 %v85_v3, %v55_v4 }
  0x89   :  { %v60_v6 = vpack.c.bf16 %v56_v5, %v56_v5 }
  0x8b   :  { %63 = vst.msk [vmem:[%s127_s3] sm:$0xf] %vm62_vm1, %v60_v6 }
  0x8e   :  { %v57_v7 = vpop.f32.mrf.mxu0 }
  0x8f   :  { %v58_v8 = vadd.f32 %v85_v3, %v57_v7 }
  0x91   :  { %v61_v9 = vpack.c.bf16 %v58_v8, %v58_v8 }
  0x93   :  { %64 = vst.msk [vmem:[%s127_s3 + $0x4] sm:$0xf] %vm62_vm1, %v61_v9 }

// kernel: _lambda_.12
= control target key start
LH: loop header
LB: loop body
LE: loop exit
PB: predicated region body
PF: predicated region fallthrough
CT: control target
= control target key end

     0   :  { %s388_s18 = smov 0   ;;  %s426_s0 = inlined_call_operand.vmem [shape: bf16[16,32], index: 0, kind: input, shape index: {}]   ;;  %s427_s1 = inlined_call_operand.vmem [shape: bf16[8,32], index: 1, kind: input, shape index: {}]   ;;  %s428_s2 = inlined_call_operand.vmem [shape: bf16[1,32], index: 2, kind: input, shape index: {}]   ;;  %s429_s3 = inlined_call_operand.vmem [shape: f32[1,32], index: 3, kind: input, shape index: {}]   ;;  %s430_s4 = inlined_call_operand.vmem [shape: f32[1,32], index: 4, kind: input, shape index: {}]   ;;  %s431_s5 = inlined_call_operand.vmem [shape: bf16[16,32], index: 5, kind: output, shape index: {}]  }
   0x1 LB: > { %s325_s19 = sadd.s32 4294967295, %s355_s18   ;;  %p329_p0 = scmp.ge.s32.totalorder %s355_s18, 1  ;;  %s355_s18 = sphi %s388_s18, %s15_s18  }
   0x2   : > { %p186_p1 = scmp.lt.s32.totalorder %s355_s18, 3 }
   0x4   : > { %p187_p2 = pnand %p329_p0, %p186_p1 }
   0x5   : > { %p212_p3 = scmp.lt.s32.totalorder (!%p187_p2), %s325_s19, 1 }
   0x6   : > { %190 = sbr.rel (%p187_p2) target bundleno = 292 (0x124), region = 40 }
   0xb   : > { %v225_v0 = vld [vmem:[%s428_s2] sm:$0x1]  ;;  %s433_s19 = smov (!%p212_p3, %s325_s19), 1  ;;  %vm229_vm0 = vcmask 261120   ;;  %v357_v10 = vmov 32.0   ;;  %vm270_vm5 = vcmask 257024  }
   0xc   : > { %v222_v1 = vld [vmem:[%s427_s1] sm:$0xf]  ;;  %v226_v2 = vunpack.c.l.bf16 %v225_v0  ;;  %s330_s24 = sshll.u32 %s433_s19, 2  ;;  %345 = vrcp.f32 %v357_v10 }
   0xd   : > { %s215_s27 = scalar_lea.vmem %s426_s0, %s330_s24  ;;  %v223_v3 = vunpack.c.l.bf16 %v222_v1  ;;  %v343_v31 = vld [vmem:[%s429_s3] ss:$0 sm:$0xff]  ;;  %s219_s9 = scalar_lea.vmem %s431_s5, %s330_s24 }
   0xe   : > { %v220_v4 = vld [vmem:[%s215_s27] sm:$0xf]  ;;  %v227_v6 = vperm.slane %v226_v2, 0 }
   0xf   : > { %v221_v5 = vunpack.c.l.bf16 %v220_v4  ;;  %v344_v33 = vld [vmem:[%s430_s4] ss:$0 sm:$0xff] }
  0x11   : > { %v224_v7 = vadd.f32 %v223_v3, %v221_v5 }
  0x12   : > { %v346_v11 = vpop.eup %345 }
  0x13   : > { %v228_v8 = vadd.f32 %v227_v6, %v224_v7  ;;  %v234_v12 = vmul.f32 32.0, %v346_v11  ;;  %vm238_vm1 = vweird.f32 %v346_v11 }
  0x15   : > { %v230_v9 = vsel %vm229_vm0, %v228_v8, 0.0  ;;  %v235_v13 = vsub.f32 1.0, %v234_v12 }
  0x16   : > { %231 = vadd.xlane.f32.xlu0 %v230_v9 }
  0x17   : > { %v236_v14 = vmul.f32 %v346_v11, %v235_v13 }
  0x19   : > { %v237_v15 = vadd.f32 %v346_v11, %v236_v14 }
  0x1b   : > { %v239_v16 = vsel %vm238_vm1, %v346_v11, %v237_v15 }
  0x89   : > { %v232_v17 = vpop.xlane.xlu0 %231 }
  0x8a   : > { %v240_v18 = vmul.f32 %v239_v16, %v232_v17 }
  0x8c   : > { %v241_v19 = vsub.f32 %v228_v8, %v240_v18 }
  0x8e   : > { %v242_v20 = vmul.f32 %v241_v19, %v241_v19 }
  0x90   : > { %v243_v21 = vsel %vm229_vm0, %v242_v20, 0.0 }
  0x91   : > { %244 = vadd.xlane.f32.xlu0 %v243_v21 }
 0x104   : > { %v245_v22 = vpop.xlane.xlu0 %244 }
 0x105   : > { %v246_v23 = vmul.f32 %v245_v22, %v239_v16 }
 0x107   : > { %v247_v24 = vadd.f32 1e-12, %v246_v23 }
 0x109   : > { %347 = vrsqrt.f32 %v247_v24  ;;  %vm254_vm3 = vweird.f32 %v247_v24 }
 0x10f   : > { %v348_v25 = vpop.eup %347 }
 0x110   : > { %v249_v26 = vmul.f32 %v348_v25, %v247_v24  ;;  %vm255_vm2 = vweird.f32 %v348_v25 }
 0x111   : > { %vm256_vm4 = vmor %vm254_vm3, %vm255_vm2 }
 0x112   : > { %v250_v27 = vmul.f32 %v348_v25, %v249_v26 }
 0x114   : > { %v251_v28 = vmul.f32 0.5, %v250_v27 }
 0x116   : > { %v252_v29 = vsub.f32 1.5, %v251_v28 }
 0x118   : > { %v253_v30 = vmul.f32 %v348_v25, %v252_v29 }
 0x11a   : > { %v257_v32 = vsel %vm256_vm4, %v348_v25, %v253_v30 }
 0x11b   : > { %v258_v34 = vmul.f32 %v257_v32, %v241_v19 }
 0x11d   : > { %v263_v35 = vmul.f32 %v343_v31, %v258_v34 }
 0x11f   : > { %v268_v36 = vadd.f32 %v344_v33, %v263_v35 }
 0x121   : > { %v269_v37 = vpack.c.bf16 %v268_v36, %v268_v36 }
 0x123   : > { %271 = vst.msk [vmem:[%s219_s9] sm:$0xf] %vm270_vm5, %v269_v37 }
 0x124 PF: > { %s15_s18 = sadd.s32 1, %s355_s18  }
 0x125   : > { %p12_p4 = scmp.ge.s32.totalorder %s15_s18, 4  }
 0x127   :  { %14 = sbr.rel (!%p12_p4) target bundleno = 1 (0x1), region = 70 }

// kernel: _lambda_.14
= control target key start
LH: loop header
LB: loop body
LE: loop exit
PB: predicated region body
PF: predicated region fallthrough
CT: control target
= control target key end

     0   :  { %s410_s9 = smov 0   ;;  %s449_s0 = inlined_call_operand.vmem [shape: bf16[16,96], index: 0, kind: input, shape index: {}]   ;;  %s450_s1 = inlined_call_operand.vmem [shape: f32[2,1,8], index: 1, kind: input, shape index: {}]   ;;  %s451_s2 = inlined_call_operand.vmem [shape: bf16[16,32], index: 2, kind: output, shape index: {}]  }
   0x1 LB: > { %s345_s10 = sadd.s32 4294967295, %s387_s9   ;;  %p349_p0 = scmp.ge.s32.totalorder %s387_s9, 1  ;;  %s387_s9 = sphi %s410_s9, %s12_s9  }
   0x2   : > { %p119_p1 = scmp.lt.s32.totalorder %s387_s9, 3 }
   0x4   : > { %p120_p2 = pnand %p349_p0, %p119_p1 }
   0x5   : > { %p142_p3 = scmp.lt.s32.totalorder (!%p120_p2), %s345_s10, 1  ;;  %s389_s18 = smov (!%p120_p2), 96  }
   0x6   : > { %123 = sbr.rel (%p120_p2) target bundleno = 759 (0x2f7), region = 28  ;;  %s390_s19 = smov (!%p120_p2), 80  }
   0x7   : > { %s391_s20 = smov (!%p120_p2), 112   ;;  %s392_s21 = smov (!%p120_p2), 48  }
   0x8   : > { %s393_s22 = smov (!%p120_p2), 64   ;;  %s394_s23 = smov (!%p120_p2), 16  }
   0xb   : > { %s453_s10 = smov (!%p142_p3, %s345_s10), 1  ;;  %vm164_vm0 = vcmask 130048   ;;  %vm184_vm1 = vcmask 64512   ;;  %vm202_vm2 = vcmask 1043456   ;;  %vm281_vm3 = vcmask 257024  }
   0xc   : > { %s350_s11 = sshll.u32 %s453_s10, 2  ;;  %s148_s17 = scalar_lea.vmem %s450_s1, %s453_s10 }
   0xd   : > { %s145_s14 = scalar_lea.vmem %s449_s0, %s350_s11  ;;  %v372_v8 = vld [vmem:[%s148_s17] ss:$0 sm:$0xff]  ;;  %s152_s26 = scalar_lea.vmem %s451_s2, %s350_s11 }
   0xe   : > { %v155_v0 = vld [vmem:[%s145_s14] sm:$0xf] }
   0xf   : > { %v160_v1 = vunpack.c.l.b16 %v155_v0 }
  0x11   : > { %v161_v2 = vpack.c.b16 %v160_v1, %v160_v1 }
  0x13   : > { %162 = vrot.lane.b32.xlu1 %v161_v2, %s389_s18  ;;  %221 = vrot.lane.b32.xlu0 %v161_v2, %s390_s19 }
  0x1b   : > { %219 = vrot.lane.b32.xlu0 %v161_v2, %s391_s20 }
  0x23   : > { %254 = vrot.lane.b32.xlu0 %v161_v2, %s392_s21 }
  0x2b   : > { %197 = vrot.lane.b32.xlu0 %v161_v2, %s393_s22 }
  0x85   : > { %v163_v3 = vpop.permute.xlu1 %162  ;;  %v222_v4 = vpop.permute.xlu0 %221 }
  0x86   : > { %v169_v5 = vsel %vm164_vm0, %v163_v3, 0  ;;  %v227_v6 = vsel %vm164_vm0, %v222_v4, 0 }
  0x87   : > { %178 = vmatpush.bf16.xpose.msra.mxu0 %v169_v5  ;;  %236 = vmatpush.bf16.xpose.msra.mxu2 %v227_v6 }
  0x8d   : > { %v220_v7 = vpop.permute.xlu0 %219 }
  0x8e   : > { %352 = vmatmul.msk.bf16.vlgmr.msra.gmra.mxu0 %vm164_vm0, %v155_v0  ;;  %354 = vmatmul.msk.bf16.vlgmr.msra.gmra.mxu2 %vm164_vm0, %v220_v7 }
  0x95   : > { %v255_v27 = vpop.permute.xlu0 %254 }
  0x96   : > { %v260_v28 = vsel %vm202_vm2, %v255_v27, 0 }
  0x97   : > { %269 = vmatpush.bf16.msra.mxu3 %v260_v28 }
  0x9d   : > { %v198_v29 = vpop.permute.xlu0 %197 }
  0x9e   : > { %v204_v30 = vsel %vm202_vm2, %v198_v29, 0 }
  0x9f   : > { %213 = vmatpush.bf16.msra.mxu1 %v204_v30 }
 0x10b   : > { %v180_v9 = vpop.f32.mrf.mxu0 }
 0x10c   : > { %v181_v10 = vadd.f32 %v372_v8, %v180_v9 }
 0x10e   : > { %v185_v11 = vsel %vm184_vm1, %v181_v10, -inf }
 0x10f   : > { %186 = vmax.xlane.f32.xlu2 %v185_v11 }
 0x111   : > { %v238_v12 = vpop.f32.mrf.mxu2 }
 0x112   : > { %v239_v13 = vadd.f32 %v372_v8, %v238_v12 }
 0x113   : > { %v182_v14 = vpop.f32.mrf.mxu0 }
 0x114   : > { %v242_v15 = vsel %vm184_vm1, %v239_v13, -inf }
 0x115   : > { %243 = vmax.xlane.f32.xlu1 %v242_v15 }
 0x119   : > { %v240_v16 = vpop.f32.mrf.mxu2 }
 0x182   : > { %v187_v17 = vpop.xlane.xlu2 %186 }
 0x183   : > { %v188_v20 = vsub.f32 %v181_v10, %v187_v17 }
 0x185   : > { %v189_v22 = vmul.f32 1.442695, %v188_v20 }
 0x188   : > { %v244_v18 = vpop.xlane.xlu1 %243 }
 0x189   : > { %v245_v19 = vsub.f32 %v239_v13, %v244_v18 }
 0x18b   : > { %v246_v21 = vmul.f32 1.442695, %v245_v19 }
 0x18d   : > { %373 = vpow2.f32 %v246_v21 }
 0x18e   : > { %375 = vpow2.f32 %v189_v22 }
 0x193   : > { %v374_v23 = vpop.eup %373 }
 0x194   : > { %v248_v24 = vsel %vm184_vm1, %v374_v23, 0.0  ;;  %v376_v25 = vpop.eup %375 }
 0x195   : > { %249 = vadd.xlane.f32.xlu2 %v248_v24  ;;  %v191_v26 = vsel %vm184_vm1, %v376_v25, 0.0 }
 0x19d   : > { %192 = vadd.xlane.f32.xlu2 %v191_v26 }
 0x208   : > { %v250_v31 = vpop.xlane.xlu2 %249 }
 0x209   : > { %377 = vrcp.f32 %v250_v31 }
 0x20f   : > { %v378_v32 = vpop.eup %377 }
 0x210   : > { %v193_v33 = vpop.xlane.xlu2 %192  ;;  %v252_v34 = vmul.f32 %v378_v32, %v374_v23 }
 0x211   : > { %379 = vrcp.f32 %v193_v33 }
 0x212   : > { %v253_v35 = vpack.c.bf16 %v252_v34, %v252_v34 }
 0x214   : > { %355 = vmatmul.msk.bf16.vlgmr.msra.gmra.mxu3 %vm184_vm1, %v253_v35 }
 0x217   : > { %v380_v36 = vpop.eup %379 }
 0x218   : > { %v195_v37 = vmul.f32 %v380_v36, %v376_v25 }
 0x21a   : > { %v196_v38 = vpack.c.bf16 %v195_v37, %v195_v37 }
 0x21c   : > { %353 = vmatmul.msk.bf16.vlgmr.msra.gmra.mxu1 %vm184_vm1, %v196_v38 }
 0x297   : > { %v271_v39 = vpop.f32.mrf.mxu3 }
 0x298   : > { %276 = vrot.lane.b32.xlu2 %v271_v39, %s394_s23 }
 0x299   : > { %v215_v40 = vpop.f32.mrf.mxu1 }
 0x29f   : > { %v273_v41 = vpop.f32.mrf.mxu3 }
 0x2a1   : > { %v217_v42 = vpop.f32.mrf.mxu1 }
 0x2f2   : > { %v277_v43 = vpop.permute.xlu2 %276 }
 0x2f3   : > { %v279_v44 = vsel %vm164_vm0, %v215_v40, %v277_v43 }
 0x2f4   : > { %v280_v45 = vpack.c.bf16 %v279_v44, %v279_v44 }
 0x2f6   : > { %282 = vst.msk [vmem:[%s152_s26] sm:$0xf] %vm281_vm3, %v280_v45 }
 0x2f7 PF: > { %s12_s9 = sadd.s32 1, %s387_s9  }
 0x2f8   : > { %p9_p4 = scmp.ge.s32.totalorder %s12_s9, 4  }
 0x2fa   :  { %11 = sbr.rel (!%p9_p4) target bundleno = 1 (0x1), region = 61 }

// kernel: _lambda_.15
= control target key start
LH: loop header
LB: loop body
LE: loop exit
PB: predicated region body
PF: predicated region fallthrough
CT: control target
= control target key end

     0   :  { %vm51_vm0 = vcmask 261120   ;;  %v177_v15 = vmov 32.0   ;;  %vm140_vm6 = vcmask 257024   ;;  %s245_s1 = inlined_call_operand.vmem [shape: bf16[32,32], index: 1, kind: input, shape index: {}]   ;;  %s246_s2 = inlined_call_operand.vmem [shape: f32[1,32], index: 2, kind: input, shape index: {}]   ;;  %s247_s0 = inlined_call_operand.vmem [shape: bf16[16,32], index: 0, kind: input, shape index: {}]   ;;  %s248_s3 = inlined_call_operand.vmem [shape: bf16[16,32], index: 3, kind: input, shape index: {}]   ;;  %s249_s4 = inlined_call_operand.vmem [shape: f32[1,32], index: 4, kind: input, shape index: {}]   ;;  %s250_s5 = inlined_call_operand.vmem [shape: f32[1,32], index: 5, kind: input, shape index: {}]   ;;  %s251_s6 = inlined_call_operand.vmem [shape: bf16[16,32], index: 6, kind: output, shape index: {}]  }
   0x1   :  { %v162_v0 = vld [vmem:[%s245_s1 + $0x8] sm:$0xff]  ;;  %v161_v1 = vld [vmem:[%s245_s1] sm:$0xff]  ;;  %171 = vrcp.f32 %v177_v15 }
   0x2   :  { %61 = vmatpush.bf16.msra.mxu0 %v162_v0  ;;  %v160_v2 = vld [vmem:[%s247_s0] sm:$0xff] }
   0x3   :  { %v164_v3 = vld [vmem:[%s248_s3] sm:$0xff]  }
   0x4   :  { %v168_v4 = vld [vmem:[%s246_s2] ss:$0 sm:$0xff]  ;;  %v165_v5 = vunpack.c.l.bf16 %v164_v3  ;;  %v166_v10 = vunpack.c.h.bf16 %v164_v3 }
   0x5   :  { %v169_v46 = vld [vmem:[%s249_s4] ss:$0 sm:$0xff] }
   0x6   :  { %62 = vmatpush.bf16.msra.mxu0 %v161_v1  ;;  %v170_v49 = vld [vmem:[%s250_s5] ss:$0 sm:$0xff] }
   0x7   :  { %v172_v16 = vpop.eup %171 }
   0x8   :  { %v82_v17 = vmul.f32 32.0, %v172_v16  ;;  %vm86_vm1 = vweird.f32 %v172_v16 }
   0x9   :  { %159 = vmatmul.msk.bf16.vlgmr.msra.gmra.mxu0 %vm51_vm0, %v160_v2 }
   0xa   :  { %v83_v18 = vsub.f32 1.0, %v82_v17 }
   0xc   :  { %v84_v19 = vmul.f32 %v172_v16, %v83_v18 }
   0xe   :  { %v85_v20 = vadd.f32 %v172_v16, %v84_v19 }
  0x10   :  { %v87_v21 = vsel %vm86_vm1, %v172_v16, %v85_v20 }
  0x86   :  { %v64_v6 = vpop.f32.mrf.mxu0 }
  0x87   :  { %v65_v7 = vadd.f32 %v168_v4, %v64_v6 }
  0x89   :  { %v73_v8 = vadd.f32 %v165_v5, %v65_v7 }
  0x8b   :  { %v75_v9 = vsel %vm51_vm0, %v73_v8, 0.0 }
  0x8c   :  { %76 = vadd.xlane.f32.xlu0 %v75_v9 }
  0x8e   :  { %v66_v11 = vpop.f32.mrf.mxu0 }
  0x8f   :  { %v67_v12 = vadd.f32 %v168_v4, %v66_v11 }
  0x91   :  { %v74_v13 = vadd.f32 %v166_v10, %v67_v12 }
  0x93   :  { %v78_v14 = vsel %vm51_vm0, %v74_v13, 0.0 }
  0x94   :  { %79 = vadd.xlane.f32.xlu0 %v78_v14 }
  0xff   :  { %v77_v22 = vpop.xlane.xlu0 %76 }
 0x100   :  { %v88_v23 = vmul.f32 %v87_v21, %v77_v22 }
 0x102   :  { %v90_v24 = vsub.f32 %v73_v8, %v88_v23 }
 0x104   :  { %v92_v25 = vmul.f32 %v90_v24, %v90_v24 }
 0x106   :  { %v94_v26 = vsel %vm51_vm0, %v92_v25, 0.0 }
 0x107   :  { %95 = vadd.xlane.f32.xlu1 %v94_v26  ;;  %v80_v27 = vpop.xlane.xlu0 %79 }
 0x108   :  { %v89_v28 = vmul.f32 %v87_v21, %v80_v27 }
 0x10a   :  { %v91_v29 = vsub.f32 %v74_v13, %v89_v28 }
 0x10c   :  { %v93_v30 = vmul.f32 %v91_v29, %v91_v29 }
 0x10e   :  { %v97_v31 = vsel %vm51_vm0, %v93_v30, 0.0 }
 0x10f   :  { %98 = vadd.xlane.f32.xlu1 %v97_v31 }
 0x17a   :  { %v96_v32 = vpop.xlane.xlu1 %95 }
 0x17b   :  { %v100_v33 = vmul.f32 %v96_v32, %v87_v21 }
 0x17d   :  { %v102_v34 = vadd.f32 1e-12, %v100_v33 }
 0x17f   :  { %173 = vrsqrt.f32 %v102_v34  ;;  %vm110_vm3 = vweird.f32 %v102_v34 }
 0x182   :  { %v99_v35 = vpop.xlane.xlu1 %98 }
 0x183   :  { %v101_v36 = vmul.f32 %v99_v35, %v87_v21 }
 0x185   :  { %v174_v37 = vpop.eup %173  ;;  %v103_v38 = vadd.f32 1e-12, %v101_v36 }
 0x186   :  { %v105_v39 = vmul.f32 %v174_v37, %v102_v34  ;;  %vm111_vm2 = vweird.f32 %v174_v37 }
 0x187   :  { %175 = vrsqrt.f32 %v103_v38  ;;  %vm112_vm4 = vmor %vm110_vm3, %vm111_vm2  ;;  %vm120_vm7 = vweird.f32 %v103_v38 }
 0x188   :  { %v106_v40 = vmul.f32 %v174_v37, %v105_v39 }
 0x18a   :  { %v107_v41 = vmul.f32 0.5, %v106_v40 }
 0x18c   :  { %v108_v42 = vsub.f32 1.5, %v107_v41 }
 0x18d   :  { %v176_v43 = vpop.eup %175 }
 0x18e   :  { %v109_v44 = vmul.f32 %v174_v37, %v108_v42  ;;  %v115_v45 = vmul.f32 %v176_v43, %v103_v38  ;;  %vm121_vm5 = vweird.f32 %v176_v43 }
 0x18f   :  { %vm122_vm8 = vmor %vm120_vm7, %vm121_vm5 }
 0x190   :  { %v113_v47 = vsel %vm112_vm4, %v174_v37, %v109_v44  ;;  %v116_v48 = vmul.f32 %v176_v43, %v115_v45 }
 0x191   :  { %v124_v50 = vmul.f32 %v113_v47, %v90_v24 }
 0x192   :  { %v117_v51 = vmul.f32 0.5, %v116_v48 }
 0x193   :  { %v130_v52 = vmul.f32 %v169_v46, %v124_v50 }
 0x194   :  { %v118_v53 = vsub.f32 1.5, %v117_v51 }
 0x195   :  { %v136_v54 = vadd.f32 %v170_v49, %v130_v52 }
 0x196   :  { %v119_v55 = vmul.f32 %v176_v43, %v118_v53 }
 0x197   :  { %v138_v56 = vpack.c.bf16 %v136_v54, %v136_v54 }
 0x198   :  { %v123_v57 = vsel %vm122_vm8, %v176_v43, %v119_v55 }
 0x199   :  { %141 = vst.msk [vmem:[%s251_s6] sm:$0xf] %vm140_vm6, %v138_v56  ;;  %v125_v58 = vmul.f32 %v123_v57, %v91_v29 }
 0x19b   :  { %v131_v59 = vmul.f32 %v169_v46, %v125_v58 }
 0x19d   :  { %v137_v60 = vadd.f32 %v170_v49, %v131_v59 }
 0x19f   :  { %v139_v61 = vpack.c.bf16 %v137_v60, %v137_v60 }
 0x1a1   :  { %142 = vst.msk [vmem:[%s251_s6 + $0x4] sm:$0xf] %vm140_vm6, %v139_v61 }

// kernel: _lambda_.16
= control target key start
LH: loop header
LB: loop body
LE: loop exit
PB: predicated region body
PF: predicated region fallthrough
CT: control target
= control target key end

     0   :  { %vm42_vm0 = vcmask 261120   ;;  %vm80_vm1 = vcmask 519168   ;;  %s146_s1 = inlined_call_operand.vmem [shape: bf16[32,64], index: 1, kind: input, shape index: {}]   ;;  %s147_s2 = inlined_call_operand.vmem [shape: f32[1,64], index: 2, kind: input, shape index: {}]   ;;  %s148_s0 = inlined_call_operand.vmem [shape: bf16[16,32], index: 0, kind: input, shape index: {}]   ;;  %s149_s3 = inlined_call_operand.vmem [shape: bf16[16,64], index: 3, kind: output, shape index: {}]  }
   0x1   :  { %v102_v0 = vld [vmem:[%s146_s1 + $0x8] sm:$0xff]  ;;  %v101_v1 = vld [vmem:[%s146_s1] sm:$0xff] }
   0x2   :  { %52 = vmatpush.bf16.msra.mxu0 %v102_v0  ;;  %v100_v2 = vld [vmem:[%s148_s0] sm:$0xff] }
   0x3   :  { %v103_v3 = vld [vmem:[%s147_s2] ss:$0 sm:$0xff] }
   0x6   :  { %53 = vmatpush.bf16.msra.mxu0 %v101_v1 }
   0x9   :  { %99 = vmatmul.msk.bf16.vlgmr.msra.gmra.mxu0 %vm42_vm0, %v100_v2 }
  0x86   :  { %v55_v4 = vpop.f32.mrf.mxu0 }
  0x87   :  { %v56_v5 = vadd.f32 %v103_v3, %v55_v4 }
  0x89   :  { %v62_v6 = vmul.f32 0.044715, %v56_v5  ;;  %v60_v19 = vmul.f32 0.5, %v56_v5 }
  0x8b   :  { %v64_v7 = vmul.f32 %v62_v6, %v56_v5 }
  0x8d   :  { %v66_v8 = vmul.f32 %v64_v7, %v56_v5 }
  0x8e   :  { %v57_v9 = vpop.f32.mrf.mxu0 }
  0x8f   :  { %v68_v10 = vadd.f32 %v66_v8, %v56_v5  ;;  %v58_v11 = vadd.f32 %v103_v3, %v57_v9 }
  0x91   :  { %v70_v12 = vmul.f32 0.7978846, %v68_v10  ;;  %v63_v13 = vmul.f32 0.044715, %v58_v11  ;;  %v61_v24 = vmul.f32 0.5, %v58_v11 }
  0x93   :  { %104 = vtanh.f32 %v70_v12  ;;  %v65_v14 = vmul.f32 %v63_v13, %v58_v11 }
  0x95   :  { %v67_v15 = vmul.f32 %v65_v14, %v58_v11 }
  0x97   :  { %v69_v16 = vadd.f32 %v67_v15, %v58_v11 }
  0x99   :  { %v105_v17 = vpop.eup %104  ;;  %v71_v18 = vmul.f32 0.7978846, %v69_v16 }
  0x9a   :  { %v74_v20 = vadd.f32 1.0, %v105_v17 }
  0x9b   :  { %106 = vtanh.f32 %v71_v18 }
  0x9c   :  { %v76_v21 = vmul.f32 %v74_v20, %v60_v19 }
  0x9e   :  { %v78_v22 = vpack.c.bf16 %v76_v21, %v76_v21 }
  0xa0   :  { %81 = vst.msk [vmem:[%s149_s3] sm:$0xf] %vm80_vm1, %v78_v22 }
  0xa1   :  { %v107_v23 = vpop.eup %106 }
  0xa2   :  { %v75_v25 = vadd.f32 1.0, %v107_v23 }
  0xa4   :  { %v77_v26 = vmul.f32 %v75_v25, %v61_v24 }
  0xa6   :  { %v79_v27 = vpack.c.bf16 %v77_v26, %v77_v26 }
  0xa8   :  { %82 = vst.msk [vmem:[%s149_s3 + $0x4] sm:$0xf] %vm80_vm1, %v79_v27 }

// kernel: _lambda_.17
= control target key start
LH: loop header
LB: loop body
LE: loop exit
PB: predicated region body
PF: predicated region fallthrough
CT: control target
= control target key end

     0   :  { %vm67_vm0 = vcmask 523264   ;;  %vm91_vm1 = vcmask 261120   ;;  %v204_v17 = vmov 32.0   ;;  %vm157_vm7 = vcmask 257024   ;;  %s277_s1 = inlined_call_operand.vmem [shape: bf16[64,32], index: 1, kind: input, shape index: {}]   ;;  %s278_s2 = inlined_call_operand.vmem [shape: f32[1,32], index: 2, kind: input, shape index: {}]   ;;  %s279_s0 = inlined_call_operand.vmem [shape: bf16[16,64], index: 0, kind: input, shape index: {}]   ;;  %s280_s3 = inlined_call_operand.vmem [shape: bf16[16,32], index: 3, kind: input, shape index: {}]   ;;  %s281_s4 = inlined_call_operand.vmem [shape: f32[1,32], index: 4, kind: input, shape index: {}]   ;;  %s282_s5 = inlined_call_operand.vmem [shape: f32[1,32], index: 5, kind: input, shape index: {}]   ;;  %s283_s6 = inlined_call_operand.vmem [shape: bf16[16,32], index: 6, kind: output, shape index: {}]  }
   0x1   :  { %v189_v0 = vld [vmem:[%s277_s1 + $0x18] sm:$0xff]  ;;  %v188_v1 = vld [vmem:[%s277_s1 + $0x10] sm:$0xff]  ;;  %v187_v2 = vld [vmem:[%s277_s1 + $0x8] sm:$0xff]  ;;  %198 = vrcp.f32 %v204_v17 }
   0x2   :  { %75 = vmatpush.bf16.msra.mxu0 %v189_v0  ;;  %v186_v3 = vld [vmem:[%s277_s1] sm:$0xff] }
   0x3   :  { %v185_v4 = vld [vmem:[%s279_s0] sm:$0xff] }
   0x4   :  { %v191_v5 = vld [vmem:[%s280_s3] sm:$0xff]  }
   0x5   :  { %v195_v6 = vld [vmem:[%s278_s2] ss:$0 sm:$0xff]  ;;  %v192_v7 = vunpack.c.l.bf16 %v191_v5  ;;  %v193_v12 = vunpack.c.h.bf16 %v191_v5 }
   0x6   :  { %76 = vmatpush.bf16.msra.mxu0 %v188_v1  ;;  %v196_v48 = vld [vmem:[%s281_s4] ss:$0 sm:$0xff] }
   0x7   :  { %v199_v18 = vpop.eup %198  ;;  %v197_v51 = vld [vmem:[%s282_s5] ss:$0 sm:$0xff] }
   0x8   :  { %v99_v19 = vmul.f32 32.0, %v199_v18  ;;  %vm103_vm2 = vweird.f32 %v199_v18 }
   0xa   :  { %77 = vmatpush.bf16.msra.mxu0 %v187_v2  ;;  %v100_v20 = vsub.f32 1.0, %v99_v19 }
   0xc   :  { %v101_v21 = vmul.f32 %v199_v18, %v100_v20 }
   0xe   :  { %78 = vmatpush.bf16.msra.mxu0 %v186_v3  ;;  %v102_v22 = vadd.f32 %v199_v18, %v101_v21 }
  0x10   :  { %v104_v23 = vsel %vm103_vm2, %v199_v18, %v102_v22 }
  0x11   :  { %184 = vmatmul.msk.bf16.vlgmr.msra.gmra.mxu0 %vm67_vm0, %v185_v4 }
  0x8e   :  { %v80_v8 = vpop.f32.mrf.mxu0 }
  0x8f   :  { %v81_v9 = vadd.f32 %v195_v6, %v80_v8 }
  0x91   :  { %v89_v10 = vadd.f32 %v192_v7, %v81_v9 }
  0x93   :  { %v92_v11 = vsel %vm91_vm1, %v89_v10, 0.0 }
  0x94   :  { %93 = vadd.xlane.f32.xlu0 %v92_v11 }
  0x96   :  { %v82_v13 = vpop.f32.mrf.mxu0 }
  0x97   :  { %v83_v14 = vadd.f32 %v195_v6, %v82_v13 }
  0x99   :  { %v90_v15 = vadd.f32 %v193_v12, %v83_v14 }
  0x9b   :  { %v95_v16 = vsel %vm91_vm1, %v90_v15, 0.0 }
  0x9c   :  { %96 = vadd.xlane.f32.xlu0 %v95_v16 }
 0x107   :  { %v94_v24 = vpop.xlane.xlu0 %93 }
 0x108   :  { %v105_v25 = vmul.f32 %v104_v23, %v94_v24 }
 0x10a   :  { %v107_v26 = vsub.f32 %v89_v10, %v105_v25 }
 0x10c   :  { %v109_v27 = vmul.f32 %v107_v26, %v107_v26 }
 0x10e   :  { %v111_v28 = vsel %vm91_vm1, %v109_v27, 0.0 }
 0x10f   :  { %112 = vadd.xlane.f32.xlu1 %v111_v28  ;;  %v97_v29 = vpop.xlane.xlu0 %96 }
 0x110   :  { %v106_v30 = vmul.f32 %v104_v23, %v97_v29 }
 0x112   :  { %v108_v31 = vsub.f32 %v90_v15, %v106_v30 }
 0x114   :  { %v110_v32 = vmul.f32 %v108_v31, %v108_v31 }
 0x116   :  { %v114_v33 = vsel %vm91_vm1, %v110_v32, 0.0 }
 0x117   :  { %115 = vadd.xlane.f32.xlu1 %v114_v33 }
 0x182   :  { %v113_v34 = vpop.xlane.xlu1 %112 }
 0x183   :  { %v117_v35 = vmul.f32 %v113_v34, %v104_v23 }
 0x185   :  { %v119_v36 = vadd.f32 1e-12, %v117_v35 }
 0x187   :  { %200 = vrsqrt.f32 %v119_v36  ;;  %vm127_vm4 = vweird.f32 %v119_v36 }
 0x18a   :  { %v116_v37 = vpop.xlane.xlu1 %115 }
 0x18b   :  { %v118_v38 = vmul.f32 %v116_v37, %v104_v23 }
 0x18d   :  { %v201_v39 = vpop.eup %200  ;;  %v120_v40 = vadd.f32 1e-12, %v118_v38 }
 0x18e   :  { %v122_v41 = vmul.f32 %v201_v39, %v119_v36  ;;  %vm128_vm3 = vweird.f32 %v201_v39 }
 0x18f   :  { %202 = vrsqrt.f32 %v120_v40  ;;  %vm129_vm5 = vmor %vm127_vm4, %vm128_vm3  ;;  %vm137_vm8 = vweird.f32 %v120_v40 }
 0x190   :  { %v123_v42 = vmul.f32 %v201_v39, %v122_v41 }
 0x192   :  { %v124_v43 = vmul.f32 0.5, %v123_v42 }
 0x194   :  { %v125_v44 = vsub.f32 1.5, %v124_v43 }
 0x195   :  { %v203_v45 = vpop.eup %202 }
 0x196   :  { %v126_v46 = vmul.f32 %v201_v39, %v125_v44  ;;  %v132_v47 = vmul.f32 %v203_v45, %v120_v40  ;;  %vm138_vm6 = vweird.f32 %v203_v45 }
 0x197   :  { %vm139_vm9 = vmor %vm137_vm8, %vm138_vm6 }
 0x198   :  { %v130_v49 = vsel %vm129_vm5, %v201_v39, %v126_v46  ;;  %v133_v50 = vmul.f32 %v203_v45, %v132_v47 }
 0x199   :  { %v141_v52 = vmul.f32 %v130_v49, %v107_v26 }
 0x19a   :  { %v134_v53 = vmul.f32 0.5, %v133_v50 }
 0x19b   :  { %v147_v54 = vmul.f32 %v196_v48, %v141_v52 }
 0x19c   :  { %v135_v55 = vsub.f32 1.5, %v134_v53 }
 0x19d   :  { %v153_v56 = vadd.f32 %v197_v51, %v147_v54 }
 0x19e   :  { %v136_v57 = vmul.f32 %v203_v45, %v135_v55 }
 0x19f   :  { %v155_v58 = vpack.c.bf16 %v153_v56, %v153_v56 }
 0x1a0   :  { %v140_v59 = vsel %vm139_vm9, %v203_v45, %v136_v57 }
 0x1a1   :  { %158 = vst.msk [vmem:[%s283_s6] sm:$0xf] %vm157_vm7, %v155_v58  ;;  %v142_v60 = vmul.f32 %v140_v59, %v108_v31 }
 0x1a3   :  { %v148_v61 = vmul.f32 %v196_v48, %v142_v60 }
 0x1a5   :  { %v154_v62 = vadd.f32 %v197_v51, %v148_v61 }
 0x1a7   :  { %v156_v63 = vpack.c.bf16 %v154_v62, %v154_v62 }
 0x1a9   :  { %159 = vst.msk [vmem:[%s283_s6 + $0x4] sm:$0xf] %vm157_vm7, %v156_v63 }

// kernel: _lambda_.23
= control target key start
LH: loop header
LB: loop body
LE: loop exit
PB: predicated region body
PF: predicated region fallthrough
CT: control target
= control target key end

     0   :  { %s224_s0 = inlined_call_operand.vmem [shape: bf16[2,32], index: 0, kind: input, shape index: {}]   ;;  %s225_s1 = inlined_call_operand.vmem [shape: bf16[32,32], index: 1, kind: input, shape index: {}]   ;;  %s226_s2 = inlined_call_operand.vmem [shape: f32[1,32], index: 2, kind: input, shape index: {}]   ;;  %s227_s3 = inlined_call_operand.vmem [shape: bf16[32,3], index: 3, kind: input, shape index: {}]   ;;  %s228_s4 = inlined_call_operand.vmem [shape: f32[1,3], index: 4, kind: input, shape index: {}]   ;;  %s229_s5 = inlined_call_operand.hbm [shape: f32[2,3], index: 5, kind: output, shape index: {}]  }
   0x1   :  { %v135_v0 = vld [vmem:[%s225_s1 + $0x8] sm:$0xff]  ;;  %v134_v1 = vld [vmem:[%s225_s1] sm:$0xff] }
   0x2   :  { %53 = vmatpush.bf16.msra.mxu0 %v135_v0 }
   0x3   :  { %10 = vsyncpa [#allocation3], 0  ;;  %v22_v2 = vld [vmem:[%s224_s0] sm:$0x1]  ;;  %vm43_vm0 = vcmask 261120   ;;  %v137_v3 = vld [vmem:[%s227_s3 + $0x8] sm:$0xff] }
   0x4   :  { %91 = vmatpush.bf16.msra.mxu1 %v137_v3  ;;  %v136_v4 = vld [vmem:[%s227_s3] sm:$0xff]  ;;  %s169_s30 = smov [#allocation2]   ;;  %s107_s8 = sshll.u32 %s229_s5, 4  ;;  %vm98_vm1 = vcmask 17408   ;;  %s108_s8 = int_to_ptr.hbm [resolvable:$true] %s107_s8 }
   0x5   :  { %v139_v5 = vld [vmem:[%s226_s2] ss:$0 sm:$0xff]  ;;  %s105_s6 = sshll.u32 %s169_s30, 4  ;;  %s106_s6 = int_to_ptr.vmem [resolvable:$true] %s105_s6 }
   0x6   :  { %54 = vmatpush.bf16.msra.mxu0 %v134_v1  ;;  %v140_v11 = vld [vmem:[%s228_s4] ss:$0 sm:$0xff] }
   0x8   :  { %92 = vmatpush.bf16.msra.mxu1 %v136_v4 }
   0x9   :  { %124 = vmatmul.msk.bf16.vlgmr.msra.gmra.mxu0 %vm43_vm0, %v22_v2 }
  0x86   :  { %v56_v6 = vpop.f32.mrf.mxu0 }
  0x87   :  { %v57_v7 = vadd.f32 %v139_v5, %v56_v6 }
  0x89   :  { %141 = vtanh.f32 %v57_v7 }
  0x8e   :  { %v58_v8 = vpop.f32.mrf.mxu0 }
  0x8f   :  { %v142_v9 = vpop.eup %141 }
  0x90   :  { %v61_v10 = vpack.c.bf16 %v142_v9, %v142_v9 }
  0x92   :  { %133 = vmatmul.msk.bf16.vlgmr.msra.gmra.mxu1 %vm43_vm0, %v61_v10 }
 0x10f   :  { %v94_v12 = vpop.f32.mrf.mxu1 }
 0x110   :  { %v95_v13 = vadd.f32 %v140_v11, %v94_v12 }
 0x112   :  { %99 = vst.msk [vmem:[#allocation2] sm:$0x3] %vm98_vm1, %v95_v13 }
 0x113   :  { %110 = dma.vmem_to_hbm [thread:$0]  %s106_s6, 32, %s108_s8, [#allocation3]  }
 0x117   :  { %v96_v14 = vpop.f32.mrf.mxu1 }
 0x118   :  { %167 = dma.done.wait [#allocation3], 32  }
 0x119   :  { %168 = vsyncadd [#allocation3], 4294967264 }
 0x11a   :  { %115 = vsyncpa [#allocation3], 1 }

</bundles_post_ra>
